<compile_context>
chip_gen: v6e
topology: v6e:2x2x1
jax: 0.10.0
libtpu: 0.0.40
codegen_flags: <defaults>
</compile_context>

<pallas_src>
import functools

import jax
import jax.numpy as jnp
from jax.experimental import pallas as pl
from jax.experimental.pallas import tpu as pltpu


def _vq_kernel(x_ref, emb_ref, hesq_ref, mask_ref, xq_ref, idx_ref, err_ref,
               *, score_dtype):
    """One (batch, hw-tile) grid step, channel-major layout.

    x_ref   : (1, D, T) f32  NCHW feature block (D == C == codebook_dim, T lane axis)
    emb_ref : (K, D)    f32  full codebook (grid-resident)
    hesq_ref: (K, 1)    f32  0.5 * |e_k|^2 (precomputed in wrapper, grid-resident)
    mask_ref: (1, 1, T) f32  codebook-mask block, read straight from the NCHW mask
    xq_ref  : (1, D, T) f32  quantized output, written straight back in NCHW layout
    idx_ref : (1, 1, T) i32  selected code index (lane-dense)
    err_ref : (1, 1, T) f32  per-token masked squared error (lane-dense, wrapper-summed)
    """
    x = x_ref[0]            # (D, T)
    e = emb_ref[...]        # (K, D)
    K = emb_ref.shape[0]

    # score[k, t] = e_k . x_t - 0.5|e_k|^2  -- argmax-equivalent to the reference
    # dist = -|x|^2 - |e|^2 + 2 x.e  (terms constant along k dropped).
    score = jax.lax.dot_general(
        e.astype(score_dtype), x.astype(score_dtype),
        (((1,), (0,)), ((), ())),
        preferred_element_type=jnp.float32)                          # (K, T) on MXU
    score = score - hesq_ref[...]                                    # (K,1) broadcast

    # Nearest code (temperature-0 gumbel_sample == argmax), first-max tie-break,
    # built from plain sublane max/min reduces.
    kiota = jax.lax.broadcasted_iota(jnp.int32, score.shape, 0)      # (K, T)
    smax = jnp.max(score, axis=0, keepdims=True)                     # (1, T)
    idx = jnp.min(jnp.where(score >= smax, kiota, K), axis=0)        # (T,) i32

    # Codebook gather via one-hot matmul: full-K MXU contraction, lane-dense out.
    onehot = (kiota == idx[None, :]).astype(jnp.float32)             # (K, T)
    xq = jax.lax.dot_general(
        e, onehot, (((0,), (0,)), ((), ())),
        preferred_element_type=jnp.float32)                          # (D, T)

    xq_ref[...] = xq[None]
    idx_ref[...] = idx[None, None, :]

    # Masked squared error per token: reduce over D (sublane) first, then one
    # lane-dense multiply by the mask row.  Summed across tiles in the wrapper.
    d2 = jnp.sum((xq - x) ** 2, axis=0, keepdims=True)               # (1, T)
    err_ref[...] = (d2 * mask_ref[0])[None]


@functools.partial(jax.jit,
                   static_argnames=("beta", "tile_hw", "use_bf16_scores"))
def mask_vector_quantize(x, embedding, codebook_mask=None, *, beta=0.25,
                         tile_hw=2048, use_bf16_scores=False):
    """Forward pass of MaskVectorQuantize.

    x            : (B, C, H, W) float32, C == codebook_dim
    embedding    : (codebook_size, codebook_dim) float32
    codebook_mask: (B, 1, H, W) float32 or None
    Returns (x_q [B,C,H,W], loss scalar, (None, None, embed_ind [B,H,W]))
    """
    B, C, H, W = x.shape
    D = C
    K = embedding.shape[0]
    HW = H * W

    # Spatial tile: lane-dense (multiple of 128) divisor of H*W, else the full
    # row (a full-extent last-dim block is always legal).
    t_hw = min(tile_hw, HW)
    if t_hw % 128 != 0 or HW % t_hw != 0:
        t_hw = HW
    # v7x megacore: make sure the parallel grid has at least 2 steps.
    while B * (HW // t_hw) < 2 and t_hw % 256 == 0 and HW % (t_hw // 2) == 0:
        t_hw //= 2
    num_hw_tiles = HW // t_hw

    # Channel-major all the way through the kernel: only the trailing spatial
    # dims are merged (free reshape), so no HBM transpose passes on x / x_q.
    x3 = x.reshape(B, C, HW).astype(jnp.float32)
    if codebook_mask is not None:
        mask3 = codebook_mask.reshape(B, 1, HW).astype(jnp.float32)
    else:
        mask3 = jnp.ones((B, 1, HW), jnp.float32)

    emb = embedding.astype(jnp.float32)
    half_e_sq = (0.5 * jnp.sum(emb * emb, axis=-1))[:, None]          # (K, 1)

    score_dtype = jnp.bfloat16 if use_bf16_scores else jnp.float32
    kernel = functools.partial(_vq_kernel, score_dtype=score_dtype)

    xq3, idx3, err3 = pl.pallas_call(
        kernel,
        out_shape=(
            jax.ShapeDtypeStruct((B, C, HW), jnp.float32),
            jax.ShapeDtypeStruct((B, 1, HW), jnp.int32),
            jax.ShapeDtypeStruct((B, 1, HW), jnp.float32),
        ),
        grid_spec=pltpu.PrefetchScalarGridSpec(
            num_scalar_prefetch=0,
            grid=(B, num_hw_tiles),
            in_specs=[
                pl.BlockSpec((1, C, t_hw), lambda b, j: (b, 0, j)),   # x block (NCHW)
                pl.BlockSpec((K, D), lambda b, j: (0, 0)),            # codebook, resident
                pl.BlockSpec((K, 1), lambda b, j: (0, 0)),            # 0.5|e|^2, resident
                pl.BlockSpec((1, 1, t_hw), lambda b, j: (b, 0, j)),   # mask block
            ],
            out_specs=[
                pl.BlockSpec((1, C, t_hw), lambda b, j: (b, 0, j)),   # x_q (NCHW)
                pl.BlockSpec((1, 1, t_hw), lambda b, j: (b, 0, j)),   # indices
                pl.BlockSpec((1, 1, t_hw), lambda b, j: (b, 0, j)),   # masked sq-error
            ],
        ),
        compiler_params=pltpu.CompilerParams(
            # Every output block is disjoint per grid step -> both grid axes are
            # safe to shard across TensorCores (v7x megacore).
            dimension_semantics=("parallel", "parallel"),
            vmem_limit_bytes=48 * 1024 * 1024,
        ),
    )(x3, emb, half_e_sq, mask3)

    # loss = ratio*beta*mean((xq-x)^2*m) + ratio*mean((xq-x)^2*m), means over M*D,
    # ratio = 1/mean(m) = M/sum(m)  =>  (1+beta) * sum((xq-x)^2*m) / (sum(m)*D).
    # NOTE: an all-zero mask yields inf/NaN, matching the PyTorch ratio=1/mask.mean().
    loss = (1.0 + beta) * jnp.sum(err3) / (jnp.sum(mask3) * D)

    x_q = xq3.reshape(B, C, H, W)          # already channel-major, free reshape
    embed_ind = idx3.reshape(B, H, W)
    return x_q, loss, (None, None, embed_ind)


def _reference(x, embedding, codebook_mask, beta=0.25):
    """Pure-JAX reference mirroring the PyTorch forward (temp=0)."""
    B, C, H, W = x.shape
    xt = jnp.transpose(x, (0, 2, 3, 1)).reshape(-1, C)
    dist = (-jnp.sum(xt**2, axis=1, keepdims=True)
            - jnp.sum(embedding**2, axis=1)[None, :]
            + 2.0 * xt @ embedding.T)
    idx = jnp.argmax(dist, axis=-1)
    xq = embedding[idx]
    mt = jnp.transpose(codebook_mask, (0, 2, 3, 1)).reshape(-1, 1)
    ratio = 1.0 / jnp.mean(mt)
    loss = (ratio * beta * jnp.mean((xq - xt) ** 2 * mt)
            + ratio * jnp.mean((xq - xt) ** 2 * mt))
    x_q = jnp.transpose(xq.reshape(B, H, W, C), (0, 3, 1, 2))
    return x_q, loss, idx.reshape(B, H, W)


if __name__ == "__main__":
    # Module hyper-parameters (deterministic, in-script init like nn.Embedding
    # uniform(-1/codebook_size, 1/codebook_size)).
    codebook_size = 256
    codebook_dim = 32
    B, H, W = 2, 16, 16

    key = jax.random.PRNGKey(0)
    kx, ke, km = jax.random.split(key, 3)
    x = jax.random.normal(kx, (B, codebook_dim, H, W), jnp.float32)
    embedding = jax.random.uniform(
        ke, (codebook_size, codebook_dim), jnp.float32,
        minval=-1.0 / codebook_size, maxval=1.0 / codebook_size)
    codebook_mask = (jax.random.uniform(km, (B, 1, H, W)) > 0.5).astype(jnp.float32)

    x_q, loss, (_, _, embed_ind) = mask_vector_quantize(
        x, embedding, codebook_mask, beta=0.25)
    jax.block_until_ready((x_q, loss, embed_ind))

    # Sanity-check against pure-JAX reference.
    x_q_ref, loss_ref, idx_ref = _reference(x, embedding, codebook_mask, beta=0.25)
    assert x_q.shape == (B, codebook_dim, H, W)
    assert embed_ind.shape == (B, H, W)
    assert jnp.all(embed_ind == idx_ref)
    assert jnp.allclose(x_q, x_q_ref, atol=1e-5, rtol=1e-5)
    assert jnp.allclose(loss, loss_ref, atol=1e-5, rtol=1e-4)

    print("KERNEL_OK")
</pallas_src>

<mosaic_0001>
module attributes {stable_mosaic.version = 11 : i64} {
  func.func @_vq_kernel(%arg0: i32, %arg1: i32, %arg2: memref<1x32x256xf32, #tpu.memory_space<vmem>>, %arg3: memref<256x32xf32, #tpu.memory_space<vmem>>, %arg4: memref<256x1xf32, #tpu.memory_space<vmem>>, %arg5: memref<1x1x256xf32, #tpu.memory_space<vmem>>, %arg6: memref<1x32x256xf32, #tpu.memory_space<vmem>>, %arg7: memref<1x1x256xi32, #tpu.memory_space<vmem>>, %arg8: memref<1x1x256xf32, #tpu.memory_space<vmem>>) attributes {dimension_semantics = [#tpu.dimension_semantics<parallel>, #tpu.dimension_semantics<parallel>], iteration_bounds = array<i64: 2, 1>, scalar_prefetch = 0 : i64, scratch_operands = 0 : i64, tpu.core_type = #tpu.core_type<tc>, window_params = [{transform_indices = @transform_0, window_bounds = array<i64: 1, 32, 256>}, {pipeline_mode = #tpu.pipeline_mode<synchronous>, transform_indices = @transform_1, window_bounds = array<i64: 256, 32>}, {pipeline_mode = #tpu.pipeline_mode<synchronous>, transform_indices = @transform_2, window_bounds = array<i64: 256, 1>}, {transform_indices = @transform_3, window_bounds = array<i64: 1, 1, 256>}, {transform_indices = @transform_4, window_bounds = array<i64: 1, 32, 256>}, {transform_indices = @transform_5, window_bounds = array<i64: 1, 1, 256>}, {transform_indices = @transform_6, window_bounds = array<i64: 1, 1, 256>}]} {
    %c0 = arith.constant 0 : index
    %c0_0 = arith.constant 0 : index
    %c0_1 = arith.constant 0 : index
    %0 = vector.load %arg2[%c0, %c0_0, %c0_1] : memref<1x32x256xf32, #tpu.memory_space<vmem>>, vector<1x32x256xf32>
    %1 = vector.shape_cast %0 : vector<1x32x256xf32> to vector<32x256xf32>
    %c0_2 = arith.constant 0 : index
    %c0_3 = arith.constant 0 : index
    %2 = vector.load %arg3[%c0_2, %c0_3] : memref<256x32xf32, #tpu.memory_space<vmem>>, vector<256x32xf32>
    %cst = arith.constant dense<0.000000e+00> : vector<256x256xf32>
    %3 = tpu.matmul %2, %1, %cst {dimension_numbers = #tpu.dot_dimension_numbers<[1], [0], [0], [1], [0, 0, 1, 1], [], []>} : vector<256x32xf32>, vector<32x256xf32>, vector<256x256xf32> -> vector<256x256xf32>
    %c0_4 = arith.constant 0 : index
    %c0_5 = arith.constant 0 : index
    %4 = vector.load %arg4[%c0_4, %c0_5] : memref<256x1xf32, #tpu.memory_space<vmem>>, vector<256x1xf32>
    %5 = vector.broadcast %4 : vector<256x1xf32> to vector<256x256xf32>
    %6 = arith.subf %3, %5 : vector<256x256xf32>
    %7 = tpu.iota {dimensions = array<i32: 0>} : vector<256x256xi32>
    %cst_6 = arith.constant dense<0xFF800000> : vector<256xf32>
    %8 = vector.multi_reduction <maximumf>, %6, %cst_6 [0] : vector<256x256xf32> to vector<256xf32>
    %9 = vector.shape_cast %8 : vector<256xf32> to vector<1x256xf32>
    %10 = vector.broadcast %9 : vector<1x256xf32> to vector<256x256xf32>
    %11 = arith.cmpf oge, %6, %10 : vector<256x256xf32>
    %c256_i32 = arith.constant 256 : i32
    %12 = vector.broadcast %c256_i32 : i32 to vector<256x256xi32>
    %13 = arith.select %11, %7, %12 : vector<256x256xi1>, vector<256x256xi32>
    %cst_7 = arith.constant dense<2147483647> : vector<256xi32>
    %14 = vector.multi_reduction <minsi>, %13, %cst_7 [0] : vector<256x256xi32> to vector<256xi32>
    %15 = vector.shape_cast %14 : vector<256xi32> to vector<1x256xi32>
    %16 = vector.broadcast %15 : vector<1x256xi32> to vector<256x256xi32>
    %17 = arith.cmpi eq, %7, %16 : vector<256x256xi32>
    %18 = arith.extui %17 : vector<256x256xi1> to vector<256x256xi32>
    %19 = arith.sitofp %18 : vector<256x256xi32> to vector<256x256xf32>
    %cst_8 = arith.constant dense<0.000000e+00> : vector<32x256xf32>
    %20 = tpu.matmul %2, %19, %cst_8 {dimension_numbers = #tpu.dot_dimension_numbers<[0], [0], [1], [1], [0, 1, 1, 1], [], []>} : vector<256x32xf32>, vector<256x256xf32>, vector<32x256xf32> -> vector<32x256xf32>
    %21 = vector.shape_cast %20 : vector<32x256xf32> to vector<1x32x256xf32>
    %c0_9 = arith.constant 0 : index
    %c0_10 = arith.constant 0 : index
    %c0_11 = arith.constant 0 : index
    %22 = vector.load %arg6[%c0_9, %c0_10, %c0_11] : memref<1x32x256xf32, #tpu.memory_space<vmem>>, vector<1x32x256xf32>
    tpu.vector_store %arg6[%c0_9, %c0_10, %c0_11], %21 {strides = array<i32>} : memref<1x32x256xf32, #tpu.memory_space<vmem>>, vector<1x32x256xf32>,
    %23 = vector.shape_cast %14 : vector<256xi32> to vector<1x1x256xi32>
    %c0_12 = arith.constant 0 : index
    %c0_13 = arith.constant 0 : index
    %c0_14 = arith.constant 0 : index
    %24 = vector.load %arg7[%c0_12, %c0_13, %c0_14] : memref<1x1x256xi32, #tpu.memory_space<vmem>>, vector<1x1x256xi32>
    tpu.vector_store %arg7[%c0_12, %c0_13, %c0_14], %23 {strides = array<i32>} : memref<1x1x256xi32, #tpu.memory_space<vmem>>, vector<1x1x256xi32>,
    %25 = arith.subf %20, %1 : vector<32x256xf32>
    %26 = arith.mulf %25, %25 : vector<32x256xf32>
    %cst_15 = arith.constant dense<0.000000e+00> : vector<256xf32>
    %27 = vector.multi_reduction <add>, %26, %cst_15 [0] : vector<32x256xf32> to vector<256xf32>
    %28 = vector.shape_cast %27 : vector<256xf32> to vector<1x256xf32>
    %c0_16 = arith.constant 0 : index
    %c0_17 = arith.constant 0 : index
    %c0_18 = arith.constant 0 : index
    %29 = vector.load %arg5[%c0_16, %c0_17, %c0_18] : memref<1x1x256xf32, #tpu.memory_space<vmem>>, vector<1x1x256xf32>
    %30 = vector.shape_cast %29 : vector<1x1x256xf32> to vector<1x256xf32>
    %31 = arith.mulf %28, %30 : vector<1x256xf32>
    %32 = vector.shape_cast %31 : vector<1x256xf32> to vector<1x1x256xf32>
    %c0_19 = arith.constant 0 : index
    %c0_20 = arith.constant 0 : index
    %c0_21 = arith.constant 0 : index
    %33 = vector.load %arg8[%c0_19, %c0_20, %c0_21] : memref<1x1x256xf32, #tpu.memory_space<vmem>>, vector<1x1x256xf32>
    tpu.vector_store %arg8[%c0_19, %c0_20, %c0_21], %32 {strides = array<i32>} : memref<1x1x256xf32, #tpu.memory_space<vmem>>, vector<1x1x256xf32>,
    return
  }
  func.func @transform_0(%arg0: i32, %arg1: i32) -> (i32, i32, i32) {
    %c0_i32 = arith.constant 0 : i32
    %c0_i32_0 = arith.constant 0 : i32
    return %arg0, %c0_i32, %arg1 : i32, i32, i32
  }
  func.func @transform_1(%arg0: i32, %arg1: i32) -> (i32, i32) {
    %c0_i32 = arith.constant 0 : i32
    %c0_i32_0 = arith.constant 0 : i32
    %c0_i32_1 = arith.constant 0 : i32
    return %c0_i32, %c0_i32_0 : i32, i32
  }
  func.func @transform_2(%arg0: i32, %arg1: i32) -> (i32, i32) {
    %c0_i32 = arith.constant 0 : i32
    %c0_i32_0 = arith.constant 0 : i32
    %c0_i32_1 = arith.constant 0 : i32
    return %c0_i32, %c0_i32_0 : i32, i32
  }
  func.func @transform_3(%arg0: i32, %arg1: i32) -> (i32, i32, i32) {
    %c0_i32 = arith.constant 0 : i32
    %c0_i32_0 = arith.constant 0 : i32
    return %arg0, %c0_i32, %arg1 : i32, i32, i32
  }
  func.func @transform_4(%arg0: i32, %arg1: i32) -> (i32, i32, i32) {
    %c0_i32 = arith.constant 0 : i32
    %c0_i32_0 = arith.constant 0 : i32
    return %arg0, %c0_i32, %arg1 : i32, i32, i32
  }
  func.func @transform_5(%arg0: i32, %arg1: i32) -> (i32, i32, i32) {
    %c0_i32 = arith.constant 0 : i32
    %c0_i32_0 = arith.constant 0 : i32
    return %arg0, %c0_i32, %arg1 : i32, i32, i32
  }
  func.func @transform_6(%arg0: i32, %arg1: i32) -> (i32, i32, i32) {
    %c0_i32 = arith.constant 0 : i32
    %c0_i32_0 = arith.constant 0 : i32
    return %arg0, %c0_i32, %arg1 : i32, i32, i32
  }
}

</mosaic_0001>

<bundles_post_ra>
// kernel: mask_vector_quantize.1
= control target key start
LH: loop header
LB: loop body
LE: loop exit
PB: predicated region body
PF: predicated region fallthrough
CT: control target
= control target key end

     0   :  { %s2353_s21 = smov 0   ;;  %s2355_s22 = smov 0   ;;  %s3791_s0 = inlined_call_operand.vmem [shape: f32[2,32,256], index: 0, kind: input, shape index: {}]   ;;  %s3792_s1 = inlined_call_operand.vmem [shape: f32[256,32], index: 1, kind: input, shape index: {}]   ;;  %s3793_s2 = inlined_call_operand.vmem [shape: f32[256,1], index: 2, kind: input, shape index: {}]   ;;  %s3794_s3 = inlined_call_operand.vmem [shape: f32[2,1,256], index: 3, kind: input, shape index: {}]   ;;  %s3795_s4 = inlined_call_operand.vmem [shape: f32[2,32,256], index: 4, kind: output, shape index: {0}]   ;;  %s3796_s5 = inlined_call_operand.vmem [shape: s32[2,1,256], index: 5, kind: output, shape index: {1}]   ;;  %s3797_s6 = inlined_call_operand.vmem [shape: f32[2,1,256], index: 6, kind: output, shape index: {2}]  }
   0x1   :  { %s2357_s23 = smov 0  }
   0x2 LB: > { %s29_s24 = sadd.s32 1, %s2308_s22  ;;  %p2028_p0 = scmp.ge.s32.totalorder %s2312_s23, 1  ;;  %s2312_s23 = sphi %s2357_s23, %s17_s23   ;;  %s2308_s22 = sphi %s2355_s22, %s3993_s22   ;;  %s2304_s21 = sphi %s2353_s21, %s3992_s21  }
   0x3   : > { %p31_p1 = scmp.ge.s32.totalorder %s29_s24, 2  ;;  %p258_p2 = scmp.lt.s32.totalorder %s2312_s23, 3 }
   0x5   : > { %s3995_s24 = smov (%p31_p1, %s29_s24), 0  ;;  %p259_p3 = pnand %p2028_p0, %p258_p2 }
   0x7   : > { %262 = sbr.rel (%p259_p3) target bundleno = 743 (0x2e7), region = 36 }
   0xc   : > { %p321_p4 = scmp.lt.s32.totalorder %s2304_s21, 1  ;;  %v2314_v0 = vmov 0.0   ;;  %v2315_v1 = vmov 0   ;;  %v761_v7 = vld [vmem:[%s3793_s2] sm:$0xff]  ;;  %v763_v9 = vld [vmem:[%s3793_s2 + $0x10] sm:$0xff]  ;;  %v762_v11 = vld [vmem:[%s3793_s2 + $0x8] sm:$0xff] }
   0xd   : > { %568 = vmatprep.mubr.f32.mxu0 %v2314_v0  ;;  %2228 = vset.pattern.permute.xlu0 %v2315_v1  ;;  %v764_v13 = vld [vmem:[%s3793_s2 + $0x18] sm:$0xff]  ;;  %v2405_v14 = vld [vmem:[%s3792_s1] sm:$0xff]  ;;  %vm407_vm0 = vcmask 261120   ;;  %v766_v16 = vld [vmem:[%s3793_s2 + $0x28] sm:$0xff] }
   0xe   : > { %s3997_s21 = smov (!%p321_p4, %s2304_s21), 1  ;;  %2229 = vset.pattern.permute.xlu1 %v2315_v1  ;;  %795 = vperm.xlu0 %2228, %v761_v7   ;;  %v765_v15 = vld [vmem:[%s3793_s2 + $0x20] sm:$0xff]  ;;  %v2419_v17 = vld [vmem:[%s3792_s1 + $0x8] sm:$0xff]  ;;  %v767_v18 = vld [vmem:[%s3793_s2 + $0x30] sm:$0xff] }
   0xf   : > { %s2198_s25 = sshll.u32 %s3997_s21, 6  ;;  %805 = vperm.xlu1 %2229, %v763_v9   ;;  %v768_v19 = vld [vmem:[%s3793_s2 + $0x38] sm:$0xff]  ;;  %v2433_v20 = vld [vmem:[%s3792_s1 + $0x10] sm:$0xff]  ;;  %v769_v21 = vld [vmem:[%s3793_s2 + $0x40] sm:$0xff]  ;;  %s3551_s7 = sshll.u32 %s3997_s21, 1 }
  0x10   : > { %s2380_s28 = scalar_lea.vmem %s3791_s0, %s2198_s25  ;;  %v770_v22 = vld [vmem:[%s3793_s2 + $0x48] sm:$0xff]  ;;  %v2447_v23 = vld [vmem:[%s3792_s1 + $0x18] sm:$0xff]  ;;  %v771_v24 = vld [vmem:[%s3793_s2 + $0x50] sm:$0xff]  ;;  %s356_s10 = scalar_lea.vmem %s3796_s5, %s3551_s7 }
  0x11   : > { %v374_v2 = vld [vmem:[%s2380_s28 + $0x38] sm:$0xff]  ;;  %v373_v3 = vld [vmem:[%s2380_s28 + $0x30] sm:$0xff]  ;;  %v372_v4 = vld [vmem:[%s2380_s28 + $0x28] sm:$0xff]  ;;  %s3750_s13 = scalar_lea.vmem %s3795_s4, %s2198_s25  ;;  %s337_s14 = scalar_lea.vmem %s3794_s3, %s3551_s7 }
  0x12   : > { %528 = vmatprep.subr.mxu0 %v374_v2  ;;  %v371_v5 = vld [vmem:[%s2380_s28 + $0x20] sm:$0xff]  ;;  %v370_v6 = vld [vmem:[%s2380_s28 + $0x18] sm:$0xff]  ;;  %v369_v8 = vld [vmem:[%s2380_s28 + $0x10] sm:$0xff]  ;;  %800 = vperm.xlu0 %2228, %v762_v11   ;;  %s365_s16 = scalar_lea.vmem %s3797_s6, %s3551_s7 }
  0x13   : > { %529 = vmatpush1.msra.mxu0 %v373_v3  ;;  %v368_v10 = vld [vmem:[%s2380_s28 + $0x8] sm:$0xff]  ;;  %v367_v12 = vld [vmem:[%s2380_s28] sm:$0xff]  ;;  %810 = vperm.xlu1 %2229, %v764_v13   ;;  %v772_v25 = vld [vmem:[%s3793_s2 + $0x58] sm:$0xff] }
  0x14   : > { %530 = vmatprep.subr.mxu0 %v372_v4  ;;  %v2461_v26 = vld [vmem:[%s3792_s1 + $0x20] sm:$0xff]  ;;  %v774_v28 = vld [vmem:[%s3793_s2 + $0x68] sm:$0xff]  ;;  %v775_v30 = vld [vmem:[%s3793_s2 + $0x70] sm:$0xff] }
  0x15   : > { %531 = vmatpush1.msra.mxu0 %v371_v5  ;;  %v773_v27 = vld [vmem:[%s3793_s2 + $0x60] sm:$0xff]  ;;  %v2475_v29 = vld [vmem:[%s3792_s1 + $0x28] sm:$0xff]  ;;  %v776_v31 = vld [vmem:[%s3793_s2 + $0x78] sm:$0xff] }
  0x16   : > { %532 = vmatprep.subr.mxu0 %v370_v6  ;;  %815 = vperm.xlu0 %2228, %v765_v15   ;;  %v2489_v32 = vld [vmem:[%s3792_s1 + $0x30] sm:$0xff]  ;;  %v777_v33 = vld [vmem:[%s3793_s2 + $0x80] sm:$0xff]  ;;  %v778_v34 = vld [vmem:[%s3793_s2 + $0x88] sm:$0xff] }
  0x17   : > { %533 = vmatpush1.msra.mxu0 %v369_v8  ;;  %820 = vperm.xlu1 %2229, %v766_v16   ;;  %v2503_v35 = vld [vmem:[%s3792_s1 + $0x38] sm:$0xff]  ;;  %v779_v36 = vld [vmem:[%s3793_s2 + $0x90] sm:$0xff]  ;;  %v2517_v38 = vld [vmem:[%s3792_s1 + $0x40] sm:$0xff] }
  0x18   : > { %534 = vmatprep.subr.mxu0 %v368_v10  ;;  %v780_v37 = vld [vmem:[%s3793_s2 + $0x98] sm:$0xff]  ;;  %v781_v39 = vld [vmem:[%s3793_s2 + $0xa0] sm:$0xff]  ;;  %v782_v40 = vld [vmem:[%s3793_s2 + $0xa8] sm:$0xff] }
  0x19   : > { %535 = vmatpush1.msra.mxu0 %v367_v12  ;;  %v2531_v41 = vld [vmem:[%s3792_s1 + $0x48] sm:$0xff]  ;;  %v783_v42 = vld [vmem:[%s3793_s2 + $0xb0] sm:$0xff]  ;;  %v784_v43 = vld [vmem:[%s3793_s2 + $0xb8] sm:$0xff] }
  0x1a   : > { %2036 = vmatmul.mubr.msk.f32.vlgmr.msra.gmra.mxu0 %vm407_vm0, %v2405_v14  ;;  %825 = vperm.xlu0 %2228, %v767_v18   ;;  %v2545_v44 = vld [vmem:[%s3792_s1 + $0x50] sm:$0xff]  ;;  %v785_v45 = vld [vmem:[%s3793_s2 + $0xc0] sm:$0xff]  ;;  %v786_v46 = vld [vmem:[%s3793_s2 + $0xc8] sm:$0xff] }
  0x1b   : > { %574 = vmatprep.mubr.f32.mxu0 %v2314_v0  ;;  %830 = vperm.xlu1 %2229, %v768_v19   ;;  %v2559_v47 = vld [vmem:[%s3792_s1 + $0x58] sm:$0xff]  ;;  %v787_v48 = vld [vmem:[%s3793_s2 + $0xd0] sm:$0xff]  ;;  %v2573_v50 = vld [vmem:[%s3792_s1 + $0x60] sm:$0xff] }
  0x1c   : > { %v788_v49 = vld [vmem:[%s3793_s2 + $0xd8] sm:$0xff]  ;;  %v789_v51 = vld [vmem:[%s3793_s2 + $0xe0] sm:$0xff]  ;;  %v790_v52 = vld [vmem:[%s3793_s2 + $0xe8] sm:$0xff] }
  0x1d   : > { %v2587_v53 = vld [vmem:[%s3792_s1 + $0x68] sm:$0xff]  ;;  %v791_v54 = vld [vmem:[%s3793_s2 + $0xf0] sm:$0xff]  ;;  %v792_v55 = vld [vmem:[%s3793_s2 + $0xf8] sm:$0xff] }
  0x1e   : > { %2037 = vmatmul.mubr.msk.f32.gmra.mxu0 %vm407_vm0, %v2419_v17  ;;  %835 = vperm.xlu0 %2228, %v769_v21   ;;  %v2601_v56 = vld [vmem:[%s3792_s1 + $0x70] sm:$0xff]  ;;  %v2609_v57 = vld [vmem:[%s3792_s1 + $0x78] sm:$0xff]  ;;  %v2617_v58 = vld [vmem:[%s3792_s1 + $0x80] sm:$0xff] }
  0x1f   : > { %580 = vmatprep.mubr.f32.mxu0 %v2314_v0  ;;  %840 = vperm.xlu1 %2229, %v770_v22   ;;  %v2625_v59 = vld [vmem:[%s3792_s1 + $0x88] sm:$0xff]  ;;  %v2633_v60 = vld [vmem:[%s3792_s1 + $0x90] sm:$0xff]  ;;  %v2641_v61 = vld [vmem:[%s3792_s1 + $0x98] sm:$0xff] }
  0x20   : > { %v2649_v62 = vld [vmem:[%s3792_s1 + $0xa0] sm:$0xff]  ;;  %v2657_v63 = vld [vmem:[%s3792_s1 + $0xa8] sm:$0xff]  ;;  %v2665_v1 = vld [vmem:[%s3792_s1 + $0xb0] sm:$0xff] }
  0x21   : > { %v2673_v2 = vld [vmem:[%s3792_s1 + $0xb8] sm:$0xff]  ;;  %v2681_v3 = vld [vmem:[%s3792_s1 + $0xc0] sm:$0xff]  ;;  %v2689_v4 = vld [vmem:[%s3792_s1 + $0xc8] sm:$0xff] }
  0x22   : > { %2038 = vmatmul.mubr.msk.f32.gmra.mxu0 %vm407_vm0, %v2433_v20  ;;  %845 = vperm.xlu0 %2228, %v771_v24   ;;  %v2697_v5 = vld [vmem:[%s3792_s1 + $0xd0] sm:$0xff]  ;;  %v2705_v6 = vld [vmem:[%s3792_s1 + $0xd8] sm:$0xff]  ;;  %v2713_v7 = vld [vmem:[%s3792_s1 + $0xe0] sm:$0xff] }
  0x23   : > { %586 = vmatprep.mubr.f32.mxu0 %v2314_v0  ;;  %850 = vperm.xlu1 %2229, %v772_v25   ;;  %v2721_v8 = vld [vmem:[%s3792_s1 + $0xe8] sm:$0xff]  ;;  %v2729_v9 = vld [vmem:[%s3792_s1 + $0xf0] sm:$0xff]  ;;  %v2737_v10 = vld [vmem:[%s3792_s1 + $0xf8] sm:$0xff] }
  0x26   : > { %2039 = vmatmul.mubr.msk.f32.gmra.mxu0 %vm407_vm0, %v2447_v23  ;;  %855 = vperm.xlu0 %2228, %v773_v27  }
  0x27   : > { %592 = vmatprep.mubr.f32.mxu0 %v2314_v0  ;;  %860 = vperm.xlu1 %2229, %v774_v28  }
  0x2a   : > { %2040 = vmatmul.mubr.msk.f32.gmra.mxu0 %vm407_vm0, %v2461_v26  ;;  %865 = vperm.xlu0 %2228, %v775_v30  }
  0x2b   : > { %598 = vmatprep.mubr.f32.mxu0 %v2314_v0  ;;  %870 = vperm.xlu1 %2229, %v776_v31  }
  0x2e   : > { %2041 = vmatmul.mubr.msk.f32.gmra.mxu0 %vm407_vm0, %v2475_v29  ;;  %875 = vperm.xlu0 %2228, %v777_v33  }
  0x2f   : > { %604 = vmatprep.mubr.f32.mxu0 %v2314_v0  ;;  %880 = vperm.xlu1 %2229, %v778_v34  }
  0x32   : > { %2042 = vmatmul.mubr.msk.f32.gmra.mxu0 %vm407_vm0, %v2489_v32  ;;  %885 = vperm.xlu0 %2228, %v779_v36  }
  0x33   : > { %610 = vmatprep.mubr.f32.mxu0 %v2314_v0  ;;  %890 = vperm.xlu1 %2229, %v780_v37  }
  0x36   : > { %2043 = vmatmul.mubr.msk.f32.gmra.mxu0 %vm407_vm0, %v2503_v35  ;;  %895 = vperm.xlu0 %2228, %v781_v39  }
  0x37   : > { %616 = vmatprep.mubr.f32.mxu0 %v2314_v0  ;;  %900 = vperm.xlu1 %2229, %v782_v40  }
  0x3a   : > { %2044 = vmatmul.mubr.msk.f32.gmra.mxu0 %vm407_vm0, %v2517_v38  ;;  %905 = vperm.xlu0 %2228, %v783_v42  }
  0x3b   : > { %622 = vmatprep.mubr.f32.mxu0 %v2314_v0  ;;  %910 = vperm.xlu1 %2229, %v784_v43  }
  0x3e   : > { %2045 = vmatmul.mubr.msk.f32.gmra.mxu0 %vm407_vm0, %v2531_v41  ;;  %915 = vperm.xlu0 %2228, %v785_v45  }
  0x3f   : > { %628 = vmatprep.mubr.f32.mxu0 %v2314_v0  ;;  %920 = vperm.xlu1 %2229, %v786_v46  }
  0x42   : > { %2046 = vmatmul.mubr.msk.f32.gmra.mxu0 %vm407_vm0, %v2545_v44  ;;  %925 = vperm.xlu0 %2228, %v787_v48  }
  0x43   : > { %634 = vmatprep.mubr.f32.mxu0 %v2314_v0  ;;  %930 = vperm.xlu1 %2229, %v788_v49  }
  0x46   : > { %2047 = vmatmul.mubr.msk.f32.gmra.mxu0 %vm407_vm0, %v2559_v47  ;;  %935 = vperm.xlu0 %2228, %v789_v51  }
  0x47   : > { %640 = vmatprep.mubr.f32.mxu0 %v2314_v0  ;;  %940 = vperm.xlu1 %2229, %v790_v52  }
  0x4a   : > { %2048 = vmatmul.mubr.msk.f32.gmra.mxu0 %vm407_vm0, %v2573_v50  ;;  %945 = vperm.xlu0 %2228, %v791_v54  }
  0x4b   : > { %646 = vmatprep.mubr.f32.mxu0 %v2314_v0  ;;  %950 = vperm.xlu1 %2229, %v792_v55  }
  0x4e   : > { %2049 = vmatmul.mubr.msk.f32.gmra.mxu0 %vm407_vm0, %v2587_v53 }
  0x4f   : > { %652 = vmatprep.mubr.f32.mxu0 %v2314_v0 }
  0x52   : > { %2050 = vmatmul.mubr.msk.f32.gmra.mxu0 %vm407_vm0, %v2601_v56 }
  0x53   : > { %658 = vmatprep.mubr.f32.mxu0 %v2314_v0 }
  0x56   : > { %2051 = vmatmul.mubr.msk.f32.gmra.mxu0 %vm407_vm0, %v2609_v57 }
  0x57   : > { %664 = vmatprep.mubr.f32.mxu0 %v2314_v0 }
  0x5a   : > { %2052 = vmatmul.mubr.msk.f32.gmra.mxu0 %vm407_vm0, %v2617_v58 }
  0x5b   : > { %670 = vmatprep.mubr.f32.mxu0 %v2314_v0 }
  0x5e   : > { %2053 = vmatmul.mubr.msk.f32.gmra.mxu0 %vm407_vm0, %v2625_v59 }
  0x5f   : > { %676 = vmatprep.mubr.f32.mxu0 %v2314_v0 }
  0x62   : > { %2054 = vmatmul.mubr.msk.f32.gmra.mxu0 %vm407_vm0, %v2633_v60 }
  0x63   : > { %682 = vmatprep.mubr.f32.mxu0 %v2314_v0 }
  0x66   : > { %2055 = vmatmul.mubr.msk.f32.gmra.mxu0 %vm407_vm0, %v2641_v61 }
  0x67   : > { %688 = vmatprep.mubr.f32.mxu0 %v2314_v0 }
  0x6a   : > { %2056 = vmatmul.mubr.msk.f32.gmra.mxu0 %vm407_vm0, %v2649_v62 }
  0x6b   : > { %694 = vmatprep.mubr.f32.mxu0 %v2314_v0 }
  0x6e   : > { %2057 = vmatmul.mubr.msk.f32.gmra.mxu0 %vm407_vm0, %v2657_v63 }
  0x6f   : > { %700 = vmatprep.mubr.f32.mxu0 %v2314_v0 }
  0x72   : > { %2058 = vmatmul.mubr.msk.f32.gmra.mxu0 %vm407_vm0, %v2665_v1 }
  0x73   : > { %706 = vmatprep.mubr.f32.mxu0 %v2314_v0 }
  0x76   : > { %2059 = vmatmul.mubr.msk.f32.gmra.mxu0 %vm407_vm0, %v2673_v2 }
  0x77   : > { %712 = vmatprep.mubr.f32.mxu0 %v2314_v0 }
  0x7a   : > { %2060 = vmatmul.mubr.msk.f32.gmra.mxu0 %vm407_vm0, %v2681_v3 }
  0x7b   : > { %718 = vmatprep.mubr.f32.mxu0 %v2314_v0 }
  0x7e   : > { %2061 = vmatmul.mubr.msk.f32.gmra.mxu0 %vm407_vm0, %v2689_v4 }
  0x7f   : > { %724 = vmatprep.mubr.f32.mxu0 %v2314_v0 }
  0x82   : > { %2062 = vmatmul.mubr.msk.f32.gmra.mxu0 %vm407_vm0, %v2697_v5 }
  0x83   : > { %730 = vmatprep.mubr.f32.mxu0 %v2314_v0 }
  0x86   : > { %2063 = vmatmul.mubr.msk.f32.gmra.mxu0 %vm407_vm0, %v2705_v6 }
  0x87   : > { %736 = vmatprep.mubr.f32.mxu0 %v2314_v0 }
  0x89   : > { %v796_v13 = vpop.permute.xlu0 %795 }
  0x8a   : > { %2064 = vmatmul.mubr.msk.f32.gmra.mxu0 %vm407_vm0, %v2713_v7  ;;  %v806_v16 = vpop.permute.xlu1 %805 }
  0x8b   : > { %742 = vmatprep.mubr.f32.mxu0 %v2314_v0 }
  0x8e   : > { %2065 = vmatmul.mubr.msk.f32.gmra.mxu0 %vm407_vm0, %v2721_v8  ;;  %v811_v30 = vpop.permute.xlu1 %810 }
  0x8f   : > { %748 = vmatprep.mubr.f32.mxu0 %v2314_v0 }
  0x92   : > { %2066 = vmatmul.mubr.msk.f32.gmra.mxu0 %vm407_vm0, %v2729_v9  ;;  %v821_v54 = vpop.permute.xlu1 %820 }
  0x93   : > { %754 = vmatprep.mubr.f32.mxu0 %v2314_v0  ;;  %v801_v0 = vpop.permute.xlu0 %800 }
  0x96   : > { %2067 = vmatmul.mubr.msk.f32.gmra.mxu0 %vm407_vm0, %v2737_v10 }
  0x97   : > { %v816_v43 = vpop.permute.xlu0 %815 }
  0xda   : > { %v570_v11 = vpop.f32.mrf.mxu0 }
  0xdb   : > { %v2741_v21 = vsub.f32 %v570_v11, %v796_v13 }
  0xdc   : > { %v572_v12 = vpop.f32.mrf.mxu0 }
  0xdd   : > { %v2745_v25 = vsub.f32 %v572_v12, %v796_v13 }
  0xde   : > { %v576_v15 = vpop.f32.mrf.mxu0 }
  0xdf   : > { %3884 = vst [vmem:[#allocation2_spill] sm:$0xff] %v2745_v25  ;;  %v2751_v33 = vsub.f32 %v576_v15, %v801_v0 }
  0xe0   : > { %v578_v18 = vpop.f32.mrf.mxu0 }
  0xe1   : > { %v2757_v39 = vsub.f32 %v578_v18, %v801_v0  ;;  %v826_v18 = vpop.permute.xlu0 %825 }
  0xe2   : > { %v582_v19 = vpop.f32.mrf.mxu0 }
  0xe3   : > { %v2743_v22 = vsub.f32 %v582_v19, %v806_v16  ;;  %3886 = vst [vmem:[#allocation4_spill] sm:$0xff] %v2757_v39 }
  0xe4   : > { %v584_v24 = vpop.f32.mrf.mxu0 }
  0xe5   : > { %v1050_v27 = vmax.f32 %v2741_v21, %v2743_v22  ;;  %v2749_v28 = vsub.f32 %v584_v24, %v806_v16 }
  0xe6   : > { %v588_v31 = vpop.f32.mrf.mxu0 }
  0xe7   : > { %3885 = vst [vmem:[#allocation3_spill] sm:$0xff] %v2749_v28  ;;  %v1087_v34 = vmax.f32 %v2745_v25, %v2749_v28  ;;  %v2755_v36 = vsub.f32 %v588_v31, %v811_v30  ;;  %v2252_v28 = vpack.i.bf16 %v2559_v47, %v2705_v6  ;;  %v2254_v25 = vpack.i.bf16 %v2573_v50, %v2713_v7 }
  0xe8   : > { %v590_v37 = vpop.f32.mrf.mxu0 }
  0xe9   : > { %v1051_v40 = vmax.f32 %v2751_v33, %v2755_v36  ;;  %v2761_v42 = vsub.f32 %v590_v37, %v811_v30  ;;  %v831_v37 = vpop.permute.xlu1 %830 }
  0xea   : > { %v594_v45 = vpop.f32.mrf.mxu0 }
  0xeb   : > { %3887 = vst [vmem:[#allocation5_spill] sm:$0xff] %v2761_v42  ;;  %v1088_v46 = vmax.f32 %v2757_v39, %v2761_v42  ;;  %v2765_v48 = vsub.f32 %v594_v45, %v816_v43  ;;  %v2250_v42 = vpack.i.bf16 %v2545_v44, %v2697_v5 }
  0xec   : > { %v596_v49 = vpop.f32.mrf.mxu0 }
  0xed   : > { %v1052_v51 = vmax.f32 %v1050_v27, %v2765_v48  ;;  %v2768_v52 = vsub.f32 %v596_v49, %v816_v43 }
  0xee   : > { %v600_v55 = vpop.f32.mrf.mxu0 }
  0xef   : > { %3888 = vst [vmem:[#allocation6_spill] sm:$0xff] %v2768_v52  ;;  %v1089_v11 = vmax.f32 %v1087_v34, %v2768_v52  ;;  %v2771_v12 = vsub.f32 %v600_v55, %v821_v54  ;;  %v836_v55 = vpop.permute.xlu0 %835  ;;  %v2248_v52 = vpack.i.bf16 %v2531_v41, %v2689_v4 }
  0xf0   : > { %v602_v13 = vpop.f32.mrf.mxu0 }
  0xf1   : > { %3889 = vst [vmem:[#allocation7_spill] sm:$0xff] %v2771_v12  ;;  %v1053_v15 = vmax.f32 %v1051_v40, %v2771_v12  ;;  %v2774_v16 = vsub.f32 %v602_v13, %v821_v54 }
  0xf2   : > { %v606_v19 = vpop.f32.mrf.mxu0 }
  0xf3   : > { %3890 = vst [vmem:[#allocation8_spill] sm:$0xff] %v2774_v16  ;;  %v1090_v0 = vmax.f32 %v1088_v46, %v2774_v16  ;;  %v2777_v24 = vsub.f32 %v606_v19, %v826_v18 }
  0xf4   : > { %v608_v27 = vpop.f32.mrf.mxu0 }
  0xf5   : > { %3891 = vst [vmem:[#allocation9_spill] sm:$0xff] %v2777_v24  ;;  %v1054_v30 = vmax.f32 %v1052_v51, %v2777_v24  ;;  %v2780_v31 = vsub.f32 %v608_v27, %v826_v18  ;;  %v2260_v24 = vpack.i.bf16 %v2609_v57, %v2737_v10 }
  0xf6   : > { %v612_v34 = vpop.f32.mrf.mxu0 }
  0xf7   : > { %3892 = vst [vmem:[#allocation10_spill] sm:$0xff] %v2780_v31  ;;  %v1091_v43 = vmax.f32 %v1089_v11, %v2780_v31  ;;  %v2783_v45 = vsub.f32 %v612_v34, %v831_v37  ;;  %v841_v11 = vpop.permute.xlu1 %840 }
  0xf8   : > { %v614_v40 = vpop.f32.mrf.mxu0 }
  0xf9   : > { %3893 = vst [vmem:[#allocation11_spill] sm:$0xff] %v2783_v45  ;;  %v1055_v49 = vmax.f32 %v1053_v15, %v2783_v45  ;;  %v2786_v54 = vsub.f32 %v614_v40, %v831_v37 }
  0xfa   : > { %v618_v46 = vpop.f32.mrf.mxu0 }
  0xfb   : > { %3894 = vst [vmem:[#allocation12_spill] sm:$0xff] %v2786_v54  ;;  %v1092_v13 = vmax.f32 %v1090_v0, %v2786_v54  ;;  %v2789_v19 = vsub.f32 %v618_v46, %v836_v55  ;;  %v846_v46 = vpop.permute.xlu0 %845 }
  0xfc   : > { %v620_v51 = vpop.f32.mrf.mxu0 }
  0xfd   : > { %3895 = vst [vmem:[#allocation13_spill] sm:$0xff] %v2789_v19  ;;  %v2792_v18 = vmax.f32 %v1054_v30, %v2789_v19  ;;  %v2794_v27 = vsub.f32 %v620_v51, %v836_v55  ;;  %v2258_v19 = vpack.i.bf16 %v2601_v56, %v2729_v9 }
  0xfe   : > { %v624_v34 = vpop.f32.mrf.mxu0 }
  0xff   : > { %3896 = vst [vmem:[#allocation14_spill] sm:$0xff] %v2794_v27  ;;  %v2797_v31 = vmax.f32 %v1091_v43, %v2794_v27  ;;  %v2799_v15 = vsub.f32 %v624_v34, %v841_v11  ;;  %v2230_v34 = vpack.i.bf16 %v2405_v14, %v2617_v58  ;;  %v2236_v58 = vpack.i.bf16 %v2447_v23, %v2641_v61  ;;  %v851_v23 = vpop.permute.xlu1 %850 }
 0x100   : > { %v626_v37 = vpop.f32.mrf.mxu0 }
 0x101   : > { %3897 = vst [vmem:[#allocation15_spill] sm:$0xff] %v2799_v15  ;;  %v2802_v40 = vmax.f32 %v1055_v49, %v2799_v15  ;;  %v2804_v0 = vsub.f32 %v626_v37, %v841_v11  ;;  %v2232_v11 = vpack.i.bf16 %v2419_v17, %v2625_v59  ;;  %2231 = vxpose.xlu0.b32.start [1/16] (narrow) %v2230_v34, 32 }
 0x102   : > { %v630_v54 = vpop.f32.mrf.mxu0  ;;  %v2238_v34 = vpack.i.bf16 %v2461_v26, %v2649_v62  ;;  %v856_v26 = vpop.permute.xlu0 %855  ;;  %v2256_v15 = vpack.i.bf16 %v2587_v53, %v2721_v8 }
 0x103   : > { %3898 = vst [vmem:[#allocation16_spill] sm:$0xff] %v2804_v0  ;;  %v2807_v30 = vmax.f32 %v1092_v13, %v2804_v0  ;;  %v2809_v55 = vsub.f32 %v630_v54, %v846_v46  ;;  %v2246_v0 = vpack.i.bf16 %v2517_v38, %v2681_v3 }
 0x104   : > { %v632_v51 = vpop.f32.mrf.mxu0 }
 0x105   : > { %v2813_v27 = vsub.f32 %v632_v51, %v846_v46  ;;  %v2234_v46 = vpack.i.bf16 %v2433_v20, %v2633_v60  ;;  %2233 = vxpose.xlu0.b32.cont [2/16] (narrow) %v2232_v11, 32  ;;  %v2240_v60 = vpack.i.bf16 %v2475_v29, %v2657_v63  ;;  %v861_v29 = vpop.permute.xlu1 %860 }
 0x106   : > { %v2817_v49 = vpop.f32.mrf.mxu0 }
 0x107   : > { %v2910_v8 = vsub.f32 %v2817_v49, %v851_v23 }
 0x108   : > { %v2823_v54 = vpop.f32.mrf.mxu0 }
 0x109   : > { %2235 = vxpose.xlu0.b32.cont [3/16] (narrow) %v2234_v46, 32  ;;  %v2242_v46 = vpack.i.bf16 %v2489_v32, %v2665_v1  ;;  %v866_v32 = vpop.permute.xlu0 %865 }
 0x10a   : > { %v2825_v37 = vpop.f32.mrf.mxu0 }
 0x10c   : > { %v2829_v51 = vpop.f32.mrf.mxu0 }
 0x10d   : > { %2237 = vxpose.xlu0.b32.cont [4/16] (narrow) %v2236_v58, 32  ;;  %v2244_v58 = vpack.i.bf16 %v2503_v35, %v2673_v2  ;;  %v876_v2 = vpop.permute.xlu0 %875  ;;  %v2924_v57 = vsub.f32 %v2829_v51, %v856_v26 }
 0x10e   : > { %v2831_v14 = vpop.f32.mrf.mxu0 }
 0x10f   : > { %v2921_v12 = vsub.f32 %v2831_v14, %v861_v29  ;;  %3900 = vst [vmem:[#allocation18_spill] sm:$0xff] %v2924_v57 }
 0x110   : > { %v2835_v17 = vpop.f32.mrf.mxu0 }
 0x111   : > { %2239 = vxpose.xlu0.b32.cont [5/16] (narrow) %v2238_v34, 32  ;;  %v886_v41 = vpop.permute.xlu0 %885 }
 0x112   : > { %v2837_v59 = vpop.f32.mrf.mxu0 }
 0x114   : > { %v2841_v13 = vpop.f32.mrf.mxu0 }
 0x115   : > { %2241 = vxpose.xlu0.b32.cont [6/16] (narrow) %v2240_v60, 32  ;;  %v871_v60 = vpop.permute.xlu1 %870  ;;  %v896_v5 = vpop.permute.xlu0 %895  ;;  %v2942_v51 = vsub.f32 %v2841_v13, %v866_v32 }
 0x116   : > { %v2843_v20 = vpop.f32.mrf.mxu0 }
 0x117   : > { %3902 = vst [vmem:[#allocation20_spill] sm:$0xff] %v2942_v51 }
 0x118   : > { %v2847_v11 = vpop.f32.mrf.mxu0 }
 0x119   : > { %2243 = vxpose.xlu0.b32.cont [7/16] (narrow) %v2242_v46, 32  ;;  %v881_v38 = vpop.permute.xlu1 %880  ;;  %v906_v50 = vpop.permute.xlu0 %905  ;;  %v2945_v14 = vsub.f32 %v2847_v11, %v871_v60 }
 0x11a   : > { %v2849_v61 = vpop.f32.mrf.mxu0 }
 0x11b   : > { %3903 = vst [vmem:[#allocation21_spill] sm:$0xff] %v2945_v14 }
 0x11c   : > { %v2853_v43 = vpop.f32.mrf.mxu0 }
 0x11d   : > { %2245 = vxpose.xlu0.b32.cont [8/16] (narrow) %v2244_v58, 32  ;;  %v916_v56 = vpop.permute.xlu0 %915 }
 0x11e   : > { %v2855_v62 = vpop.f32.mrf.mxu0 }
 0x120   : > { %v2859_v63 = vpop.f32.mrf.mxu0 }
 0x121   : > { %2247 = vxpose.xlu0.b32.cont [9/16] (narrow) %v2246_v0, 32  ;;  %v891_v0 = vpop.permute.xlu1 %890 }
 0x122   : > { %v2861_v34 = vpop.f32.mrf.mxu0 }
 0x124   : > { %v2865_v1 = vpop.f32.mrf.mxu0 }
 0x125   : > { %2249 = vxpose.xlu0.b32.cont [10/16] (narrow) %v2248_v52, 32  ;;  %v901_v47 = vpop.permute.xlu1 %900 }
 0x126   : > { %v2867_v16 = vpop.f32.mrf.mxu0 }
 0x128   : > { %v2871_v35 = vpop.f32.mrf.mxu0 }
 0x129   : > { %2251 = vxpose.xlu0.b32.cont [11/16] (narrow) %v2250_v42, 32 }
 0x12a   : > { %v2873_v46 = vpop.f32.mrf.mxu0 }
 0x12c   : > { %v2877_v3 = vpop.f32.mrf.mxu0 }
 0x12d   : > { %2253 = vxpose.xlu0.b32.cont [12/16] (narrow) %v2252_v28, 32  ;;  %v911_v28 = vpop.permute.xlu1 %910 }
 0x12e   : > { %v2879_v58 = vpop.f32.mrf.mxu0 }
 0x130   : > { %v2883_v4 = vpop.f32.mrf.mxu0 }
 0x131   : > { %2255 = vxpose.xlu0.b32.cont [13/16] (narrow) %v2254_v25, 32  ;;  %v2913_v25 = vsub.f32 %v2823_v54, %v851_v23  ;;  %v921_v10 = vpop.permute.xlu1 %920  ;;  %v1059_v54 = vmax.f32 %v2802_v40, %v2910_v8  ;;  %v2934_v23 = vsub.f32 %v2837_v59, %v866_v32  ;;  %v3904_v40 = vmax.f32 %v2792_v18, %v2809_v55  ;;  %v926_v32 = vpop.permute.xlu0 %925 }
 0x132   : > { %v2885_v39 = vpop.f32.mrf.mxu0  ;;  %v2967_v18 = vsub.f32 %v2859_v63, %v881_v38  ;;  %v2983_v63 = vsub.f32 %v2871_v35, %v891_v0  ;;  %v2999_v35 = vsub.f32 %v2883_v4, %v901_v47 }
 0x133   : > { %3899 = vst [vmem:[#allocation17_spill] sm:$0xff] %v2913_v25  ;;  %v1061_v59 = vmax.f32 %v1059_v54, %v2921_v12 }
 0x134   : > { %v2889_v44 = vpop.f32.mrf.mxu0  ;;  %3907 = vst [vmem:[#allocation23_spill] sm:$0xff] %v2967_v18  ;;  %3909 = vst [vmem:[#allocation25_spill] sm:$0xff] %v2983_v63 }
 0x135   : > { %2257 = vxpose.xlu0.b32.cont [14/16] (narrow) %v2256_v15, 32  ;;  %v2918_v15 = vsub.f32 %v2825_v37, %v856_v26  ;;  %v2937_v37 = vsub.f32 %v2843_v20, %v871_v60  ;;  %v2953_v20 = vsub.f32 %v2849_v61, %v876_v2  ;;  %v2964_v60 = vsub.f32 %v2853_v43, %v876_v2 }
 0x136   : > { %v2891_v52 = vpop.f32.mrf.mxu0  ;;  %v2980_v2 = vsub.f32 %v2865_v1, %v886_v41  ;;  %v2996_v1 = vsub.f32 %v2877_v3, %v896_v5  ;;  %3911 = vst [vmem:[#allocation27_spill] sm:$0xff] %v2999_v35 }
 0x137   : > { %v1060_v26 = vmax.f32 %v3904_v40, %v2918_v15  ;;  %3906 = vst [vmem:[#allocation22_spill] sm:$0xff] %v2964_v60  ;;  %v2972_v40 = vsub.f32 %v2861_v34, %v886_v41 }
 0x138   : > { %v2895_v6 = vpop.f32.mrf.mxu0  ;;  %3908 = vst [vmem:[#allocation24_spill] sm:$0xff] %v2980_v2  ;;  %3910 = vst [vmem:[#allocation26_spill] sm:$0xff] %v2996_v1 }
 0x139   : > { %2259 = vxpose.xlu0.b32.cont [15/16] (narrow) %v2258_v19, 32  ;;  %v2927_v19 = vsub.f32 %v2835_v17, %v861_v29  ;;  %v2956_v29 = vsub.f32 %v2855_v62, %v881_v38  ;;  %v1062_v61 = vmax.f32 %v1060_v26, %v2934_v23  ;;  %v1063_v62 = vmax.f32 %v1061_v59, %v2937_v37 }
 0x13a   : > { %v2897_v42 = vpop.f32.mrf.mxu0  ;;  %v2988_v59 = vsub.f32 %v2873_v46, %v896_v5  ;;  %v3004_v46 = vsub.f32 %v2885_v39, %v906_v50  ;;  %v3012_v5 = vsub.f32 %v2889_v44, %v906_v50  ;;  %v3015_v4 = vsub.f32 %v2895_v6, %v911_v28 }
 0x13b   : > { %3901 = vst [vmem:[#allocation19_spill] sm:$0xff] %v2927_v19  ;;  %v1064_v26 = vmax.f32 %v1062_v61, %v2953_v20  ;;  %v1065_v34 = vmax.f32 %v1063_v62, %v2956_v29  ;;  %v936_v62 = vpop.permute.xlu0 %935 }
 0x13c   : > { %v2901_v7 = vpop.f32.mrf.mxu0  ;;  %3912 = vst [vmem:[#allocation28_spill] sm:$0xff] %v3012_v5  ;;  %3913 = vst [vmem:[#allocation29_spill] sm:$0xff] %v3015_v4 }
 0x13d   : > { %2261 = vxpose.xlu0.b32.end [16/16] (narrow) %v2260_v24, 32  ;;  %v1096_v24 = vmax.f32 %v2807_v30, %v2913_v25  ;;  %v3905_v30 = vmax.f32 %v2797_v31, %v2813_v27  ;;  %v2975_v31 = vsub.f32 %v2867_v16, %v891_v0  ;;  %v2991_v16 = vsub.f32 %v2879_v58, %v901_v47 }
 0x13e   : > { %v2903_v45 = vpop.f32.mrf.mxu0  ;;  %v1066_v0 = vmax.f32 %v1064_v26, %v2972_v40  ;;  %v3007_v58 = vsub.f32 %v2891_v52, %v911_v28  ;;  %v3020_v26 = vsub.f32 %v2897_v42, %v916_v56  ;;  %v3028_v50 = vsub.f32 %v2901_v7, %v916_v56 }
 0x13f   : > { %v1097_v13 = vmax.f32 %v3905_v30, %v2924_v57  ;;  %v1098_v11 = vmax.f32 %v1096_v24, %v2927_v19  ;;  %v931_v30 = vpop.permute.xlu1 %930  ;;  %v1067_v61 = vmax.f32 %v1065_v34, %v2975_v31  ;;  %v3023_v52 = vsub.f32 %v2903_v45, %v921_v10 }
 0x140   : > { %v2907_v53 = vpop.f32.mrf.mxu0  ;;  %3914 = vst [vmem:[#allocation30_spill] sm:$0xff] %v3028_v50 }
 0x141   : > { %v1099_v24 = vmax.f32 %v1097_v13, %v2942_v51  ;;  %v1100_v43 = vmax.f32 %v1098_v11, %v2945_v14  ;;  %v1069_v39 = vmax.f32 %v1067_v61, %v2991_v16  ;;  %v3031_v6 = vsub.f32 %v2907_v53, %v921_v10 }
 0x142   : > { %v2915_v9 = vpop.f32.mrf.mxu0 }
 0x143   : > { %v1101_v13 = vmax.f32 %v1099_v24, %v2964_v60  ;;  %v1102_v11 = vmax.f32 %v1100_v43, %v2967_v18  ;;  %v1068_v43 = vmax.f32 %v1066_v0, %v2988_v59  ;;  %v941_v34 = vpop.permute.xlu1 %940  ;;  %3915 = vst [vmem:[#allocation31_spill] sm:$0xff] %v3031_v6  ;;  %v1071_v42 = vmax.f32 %v1069_v39, %v3007_v58 }
 0x144   : > { %v2929_v49 = vpop.f32.mrf.mxu0  ;;  %v3036_v0 = vsub.f32 %v2915_v9, %v926_v32 }
 0x145   : > { %v1103_v24 = vmax.f32 %v1101_v13, %v2980_v2  ;;  %v1104_v3 = vmax.f32 %v1102_v11, %v2983_v63  ;;  %v1070_v11 = vmax.f32 %v1068_v43, %v3004_v46  ;;  %v3043_v7 = vsub.f32 %v2929_v49, %v926_v32 }
 0x146   : > { %v732_v17 = vpop.f32.mrf.mxu0 }
 0x147   : > { %v1105_v13 = vmax.f32 %v1103_v24, %v2996_v1  ;;  %v1106_v44 = vmax.f32 %v1104_v3, %v2999_v35  ;;  %v3038_v45 = vsub.f32 %v732_v17, %v931_v30  ;;  %3916 = vst [vmem:[#allocation32_spill] sm:$0xff] %v3043_v7  ;;  %v1072_v10 = vmax.f32 %v1070_v11, %v3020_v26  ;;  %v946_v17 = vpop.permute.xlu0 %945 }
 0x148   : > { %v734_v54 = vpop.f32.mrf.mxu0  ;;  %v1073_v3 = vmax.f32 %v1071_v42, %v3023_v52 }
 0x149   : > { %v1107_v61 = vmax.f32 %v1105_v13, %v3012_v5  ;;  %v1108_v24 = vmax.f32 %v1106_v44, %v3015_v4  ;;  %v3045_v56 = vsub.f32 %v734_v54, %v931_v30  ;;  %v1074_v32 = vmax.f32 %v1072_v10, %v3036_v0 }
 0x14a   : > { %v738_v38 = vpop.f32.mrf.mxu0  ;;  %v1075_v54 = vmax.f32 %v1073_v3, %v3038_v45 }
 0x14b   : > { %3917 = vst [vmem:[#allocation33_spill] sm:$0xff] %v3045_v56  ;;  %v3049_v43 = vsub.f32 %v738_v38, %v936_v62  ;;  %v1109_v39 = vmax.f32 %v1107_v61, %v3028_v50  ;;  %v1110_v13 = vmax.f32 %v1108_v24, %v3031_v6  ;;  %v951_v38 = vpop.permute.xlu1 %950 }
 0x14c   : > { %v740_v41 = vpop.f32.mrf.mxu0 }
 0x14d   : > { %3918 = vst [vmem:[#allocation34_spill] sm:$0xff] %v3049_v43  ;;  %v3055_v44 = vsub.f32 %v740_v41, %v936_v62  ;;  %v1112_v42 = vmax.f32 %v1110_v13, %v3045_v56  ;;  %v1076_v61 = vmax.f32 %v1074_v32, %v3049_v43 }
 0x14e   : > { %v744_v47 = vpop.f32.mrf.mxu0 }
 0x14f   : > { %v3051_v9 = vsub.f32 %v744_v47, %v941_v34  ;;  %3920 = vst [vmem:[#allocation36_spill] sm:$0xff] %v3055_v44  ;;  %v1111_v47 = vmax.f32 %v1109_v39, %v3043_v7 }
 0x150   : > { %v746_v28 = vpop.f32.mrf.mxu0 }
 0x151   : > { %3919 = vst [vmem:[#allocation35_spill] sm:$0xff] %v3051_v9  ;;  %v3059_v30 = vsub.f32 %v746_v28, %v941_v34  ;;  %v1077_v41 = vmax.f32 %v1075_v54, %v3051_v9  ;;  %v1113_v10 = vmax.f32 %v1111_v47, %v3055_v44  ;;  %v3838_v47 = vlaneseq }
 0x152   : > { %v750_v53 = vpop.f32.mrf.mxu0 }
 0x153   : > { %3921 = vst [vmem:[#allocation37_spill] sm:$0xff] %v3059_v30  ;;  %v3061_v11 = vsub.f32 %v750_v53, %v946_v17  ;;  %v1114_v28 = vmax.f32 %v1112_v42, %v3059_v30 }
 0x154   : > { %v752_v49 = vpop.f32.mrf.mxu0 }
 0x155   : > { %3922 = vst [vmem:[#allocation38_spill] sm:$0xff] %v3061_v11  ;;  %v3067_v62 = vsub.f32 %v752_v49, %v946_v17  ;;  %v1078_v53 = vmax.f32 %v1076_v61, %v3061_v11  ;;  %v3082_v61 = vshrl.u32 %v3838_v47, 7 }
 0x156   : > { %v756_v4 = vpop.f32.mrf.mxu0 }
 0x157   : > { %3923 = vst [vmem:[#allocation39_spill] sm:$0xff] %v3067_v62  ;;  %v3069_v24 = vsub.f32 %v756_v4, %v951_v38  ;;  %v1115_v13 = vmax.f32 %v1113_v10, %v3067_v62  ;;  %v3137_v47 = vadd.s32 88, %v3082_v61  ;;  %v3143_v62 = vadd.s32 104, %v3082_v61 }
 0x158   : > { %v758_v34 = vpop.f32.mrf.mxu0  ;;  %v3146_v30 = vadd.s32 112, %v3082_v61  ;;  %v3149_v50 = vadd.s32 120, %v3082_v61  ;;  %v3152_v35 = vadd.s32 128, %v3082_v61  ;;  %v3155_v1 = vadd.s32 136, %v3082_v61 }
 0x159   : > { %3924 = vst [vmem:[#allocation40_spill] sm:$0xff] %v3069_v24  ;;  %v1079_v3 = vmax.f32 %v1077_v41, %v3069_v24  ;;  %v3075_v39 = vsub.f32 %v758_v34, %v951_v38  ;;  %v3930_v41 = vld [vmem:[#allocation15_spill] sm:$0xff]  ;;  %v3107_v34 = vadd.s32 8, %v3082_v61  ;;  %v3158_v63 = vadd.s32 144, %v3082_v61 }
 0x15a   : > { %v3161_v2 = vadd.s32 152, %v3082_v61  ;;  %v3164_v18 = vadd.s32 160, %v3082_v61  ;;  %v3167_v60 = vadd.s32 168, %v3082_v61  ;;  %v3176_v14 = vadd.s32 192, %v3082_v61 }
 0x15b   : > { %3925 = vst [vmem:[#allocation41_spill] sm:$0xff] %v3075_v39  ;;  %v1080_v32 = vmax.f32 %v1078_v53, %v1079_v3  ;;  %v1116_v54 = vmax.f32 %v1114_v28, %v3075_v39  ;;  %v3110_v28 = vadd.s32 16, %v3082_v61  ;;  %v3113_v53 = vadd.s32 24, %v3082_v61 }
 0x15c   : > { %v3116_v3 = vadd.s32 32, %v3082_v61  ;;  %v3140_v39 = vadd.s32 96, %v3082_v61  ;;  %v3179_v51 = vadd.s32 200, %v3082_v61  ;;  %v3182_v19 = vadd.s32 208, %v3082_v61 }
 0x15d   : > { %v1081_v17 = vrot.slane %v1080_v32, 4  ;;  %v1117_v49 = vmax.f32 %v1115_v13, %v1116_v54  ;;  %v3119_v13 = vadd.s32 40, %v3082_v61  ;;  %v3125_v54 = vadd.s32 56, %v3082_v61 }
 0x15e   : > { %v3185_v57 = vadd.s32 216, %v3082_v61  ;;  %v3188_v25 = vadd.s32 224, %v3082_v61  ;;  %v3191_v24 = vadd.s32 232, %v3082_v61  ;;  %v3194_v11 = vadd.s32 240, %v3082_v61 }
 0x15f   : > { %v1082_v4 = vmax.f32 %v1080_v32, %v1081_v17  ;;  %v1118_v44 = vrot.slane %v1117_v49, 4  ;;  %v3122_v32 = vadd.s32 48, %v3082_v61  ;;  %v3128_v17 = vadd.s32 64, %v3082_v61 }
 0x160   : > { %3935 = vst [vmem:[#allocation15_spill] sm:$0xff] %v3185_v57  ;;  %3936 = vst [vmem:[#allocation42_spill] sm:$0xff] %v3188_v25 }
 0x161   : > { %v1083_v56 = vrot.slane %v1082_v4, 2  ;;  %v1119_v38 = vmax.f32 %v1117_v49, %v1118_v44  ;;  %v3929_v44 = vld [vmem:[#allocation13_spill] sm:$0xff]  ;;  %v3131_v49 = vadd.s32 72, %v3082_v61  ;;  %3937 = vst [vmem:[#allocation43_spill] sm:$0xff] %v3191_v24  ;;  %3938 = vst [vmem:[#allocation44_spill] sm:$0xff] %v3194_v11  ;;  %v3213_v24 = vadd.s32 248, %v3082_v61 }
 0x163   : > { %v1084_v7 = vmax.f32 %v1082_v4, %v1083_v56  ;;  %v3928_v56 = vld [vmem:[#allocation11_spill] sm:$0xff]  ;;  %v1120_v10 = vrot.slane %v1119_v38, 2  ;;  %3934 = vst [vmem:[#allocation13_spill] sm:$0xff] %v3131_v49  ;;  %v3134_v4 = vadd.s32 80, %v3082_v61 }
 0x164   : > { %3933 = vst [vmem:[#allocation11_spill] sm:$0xff] %v3128_v17 }
 0x165   : > { %v1085_v6 = vrot.slane %v1084_v7, 1  ;;  %v1121_v5 = vmax.f32 %v1119_v38, %v1120_v10  ;;  %v3170_v38 = vadd.s32 176, %v3082_v61  ;;  %v3173_v10 = vadd.s32 184, %v3082_v61 }
 0x167   : > { %v3079_v42 = vmax.f32 %v1084_v7, %v1085_v6  ;;  %v3926_v6 = vld [vmem:[#allocation7_spill] sm:$0xff]  ;;  %v3927_v7 = vld [vmem:[#allocation9_spill] sm:$0xff]  ;;  %v1122_v9 = vrot.slane %v1121_v5, 1 }
 0x168   : > { %3931 = vst [vmem:[#allocation7_spill] sm:$0xff] %v3116_v3  ;;  %3932 = vst [vmem:[#allocation9_spill] sm:$0xff] %v3125_v54 }
 0x169   : > { %vm1124_vm1 = vcmp.ge.f32.partialorder %v2741_v21, %v3079_v42  ;;  %vm1126_vm2 = vcmp.ge.f32.partialorder %v2751_v33, %v3079_v42  ;;  %vm1128_vm3 = vcmp.ge.f32.partialorder %v2743_v22, %v3079_v42  ;;  %vm1130_vm4 = vcmp.ge.f32.partialorder %v2755_v36, %v3079_v42 }
 0x16a   : > { %vm1132_vm5 = vcmp.ge.f32.partialorder %v2765_v48, %v3079_v42  ;;  %vm1134_vm6 = vcmp.ge.f32.partialorder %v3926_v6, %v3079_v42  ;;  %vm1136_vm7 = vcmp.ge.f32.partialorder %v3927_v7, %v3079_v42  ;;  %vm1138_vm8 = vcmp.ge.f32.partialorder %v3928_v56, %v3079_v42 }
 0x16b   : > { %vm1140_vm9 = vcmp.ge.f32.partialorder %v3929_v44, %v3079_v42  ;;  %vm1142_vm10 = vcmp.ge.f32.partialorder %v3930_v41, %v3079_v42  ;;  %vm1144_vm11 = vcmp.ge.f32.partialorder %v2809_v55, %v3079_v42  ;;  %v1188_v43 = vsel %vm1124_vm1, %v3082_v61, 256  ;;  %v3939_v44 = vld [vmem:[#allocation2_spill] sm:$0xff]  ;;  %v3941_v41 = vld [vmem:[#allocation3_spill] sm:$0xff] }
 0x16c   : > { %v1190_v57 = vsel %vm1126_vm2, %v3107_v34, 256  ;;  %v1192_v25 = vsel %vm1128_vm3, %v3110_v28, 256  ;;  %v1194_v11 = vsel %vm1130_vm4, %v3113_v53, 256  ;;  %vm1146_vm12 = vcmp.ge.f32.partialorder %v2910_v8, %v3079_v42  ;;  %v3943_v55 = vld [vmem:[#allocation6_spill] sm:$0xff] }
 0x16d   : > { %vm1148_vm13 = vcmp.ge.f32.partialorder %v2918_v15, %v3079_v42  ;;  %vm1150_vm14 = vcmp.ge.f32.partialorder %v2921_v12, %v3079_v42  ;;  %v1196_v21 = vsel %vm1132_vm5, %v3116_v3, 256  ;;  %v1198_v22 = vsel %vm1134_vm6, %v3119_v13, 256 }
 0x16e   : > { %v1200_v33 = vsel %vm1136_vm7, %v3122_v32, 256  ;;  %v1202_v36 = vsel %vm1138_vm8, %v3125_v54, 256  ;;  %v1204_v48 = vsel %vm1140_vm9, %v3128_v17, 256  ;;  %vm1252_vm15 = vcmp.lt.s32.totalorder %v1188_v43, %v1192_v25 }
 0x16f   : > { %vm1254_vm0 = vcmp.lt.s32.totalorder %v1190_v57, %v1194_v11  ;;  %v3241_v3 = vmax.f32 %v1121_v5, %v1122_v9  ;;  %v1206_v6 = vsel %vm1142_vm10, %v3131_v49, 256  ;;  %v1208_v7 = vsel %vm1144_vm11, %v3134_v4, 256  ;;  %v3940_v5 = vld [vmem:[#allocation4_spill] sm:$0xff]  ;;  %v3942_v49 = vld [vmem:[#allocation5_spill] sm:$0xff] }
 0x170   : > { %v1253_v56 = vsel %vm1252_vm15, %v1188_v43, %v1192_v25  ;;  %v1255_v54 = vsel %vm1254_vm0, %v1190_v57, %v1194_v11  ;;  %v3944_v25 = vld [vmem:[#allocation8_spill] sm:$0xff]  ;;  %v3945_v11 = vld [vmem:[#allocation10_spill] sm:$0xff]  ;;  %vm1154_vm15 = vcmp.ge.f32.partialorder %v2937_v37, %v3079_v42  ;;  %v1214_v8 = vsel %vm1150_vm14, %v3143_v62, 256 }
 0x171   : > { %vm1256_vm1 = vcmp.lt.s32.totalorder %v1253_v56, %v1196_v21  ;;  %vm1258_vm2 = vcmp.lt.s32.totalorder %v1255_v54, %v1198_v22  ;;  %vm1125_vm3 = vcmp.ge.f32.partialorder %v3939_v44, %v3241_v3  ;;  %vm1127_vm4 = vcmp.ge.f32.partialorder %v3940_v5, %v3241_v3 }
 0x172   : > { %v1257_v9 = vsel %vm1256_vm1, %v1253_v56, %v1196_v21  ;;  %v1259_v17 = vsel %vm1258_vm2, %v1255_v54, %v1198_v22  ;;  %vm1129_vm5 = vcmp.ge.f32.partialorder %v3941_v41, %v3241_v3  ;;  %vm1133_vm9 = vcmp.ge.f32.partialorder %v3943_v55, %v3241_v3  ;;  %v3946_v54 = vld [vmem:[#allocation12_spill] sm:$0xff]  ;;  %v3947_v21 = vld [vmem:[#allocation14_spill] sm:$0xff] }
 0x173   : > { %vm1260_vm7 = vcmp.lt.s32.totalorder %v1257_v9, %v1200_v33  ;;  %vm1262_vm8 = vcmp.lt.s32.totalorder %v1259_v17, %v1202_v36  ;;  %vm1135_vm10 = vcmp.ge.f32.partialorder %v3944_v25, %v3241_v3  ;;  %v3948_v22 = vld [vmem:[#allocation16_spill] sm:$0xff]  ;;  %v1212_v56 = vsel %vm1148_vm13, %v3140_v39, 256  ;;  %v3968_v25 = vld [vmem:[#allocation21_spill] sm:$0xff] }
 0x174   : > { %v1261_v57 = vsel %vm1260_vm7, %v1257_v9, %v1200_v33  ;;  %v1263_v43 = vsel %vm1262_vm8, %v1259_v17, %v1202_v36  ;;  %v1210_v33 = vsel %vm1146_vm12, %v3137_v47, 256  ;;  %vm1152_vm8 = vcmp.ge.f32.partialorder %v2934_v23, %v3079_v42  ;;  %v3961_v41 = vld [vmem:[#allocation20_spill] sm:$0xff] }
 0x175   : > { %vm1264_vm0 = vcmp.lt.s32.totalorder %v1261_v57, %v1204_v48  ;;  %vm1266_vm1 = vcmp.lt.s32.totalorder %v1263_v43, %v1206_v6  ;;  %vm1156_vm12 = vcmp.ge.f32.partialorder %v2953_v20, %v3079_v42  ;;  %v1216_v23 = vsel %vm1152_vm8, %v3146_v30, 256 }
 0x176   : > { %v1265_v17 = vsel %vm1264_vm0, %v1261_v57, %v1204_v48  ;;  %v1267_v36 = vsel %vm1266_vm1, %v1263_v43, %v1206_v6  ;;  %vm1158_vm0 = vcmp.ge.f32.partialorder %v2956_v29, %v3079_v42  ;;  %v1218_v15 = vsel %vm1154_vm15, %v3149_v50, 256 }
 0x177   : > { %vm1268_vm2 = vcmp.lt.s32.totalorder %v1265_v17, %v1208_v7  ;;  %vm1270_vm11 = vcmp.lt.s32.totalorder %v1267_v36, %v1210_v33  ;;  %vm1160_vm13 = vcmp.ge.f32.partialorder %v2972_v40, %v3079_v42  ;;  %vm1162_vm14 = vcmp.ge.f32.partialorder %v2975_v31, %v3079_v42 }
 0x178   : > { %v1269_v48 = vsel %vm1268_vm2, %v1265_v17, %v1208_v7  ;;  %v1271_v6 = vsel %vm1270_vm11, %v1267_v36, %v1210_v33  ;;  %v1220_v12 = vsel %vm1156_vm12, %v3152_v35, 256  ;;  %v1222_v20 = vsel %vm1158_vm0, %v3155_v1, 256 }
 0x179   : > { %vm1272_vm1 = vcmp.lt.s32.totalorder %v1269_v48, %v1212_v56  ;;  %vm1274_vm7 = vcmp.lt.s32.totalorder %v1271_v6, %v1214_v8  ;;  %vm1164_vm8 = vcmp.ge.f32.partialorder %v2988_v59, %v3079_v42  ;;  %vm1166_vm15 = vcmp.ge.f32.partialorder %v2991_v16, %v3079_v42 }
 0x17a   : > { %v1273_v37 = vsel %vm1272_vm1, %v1269_v48, %v1212_v56  ;;  %v1275_v9 = vsel %vm1274_vm7, %v1271_v6, %v1214_v8  ;;  %v1224_v40 = vsel %vm1160_vm13, %v3158_v63, 256  ;;  %v1226_v31 = vsel %vm1162_vm14, %v3161_v2, 256 }
 0x17b   : > { %vm1276_vm11 = vcmp.lt.s32.totalorder %v1273_v37, %v1216_v23  ;;  %vm1278_vm2 = vcmp.lt.s32.totalorder %v1275_v9, %v1218_v15  ;;  %vm1168_vm12 = vcmp.ge.f32.partialorder %v3004_v46, %v3079_v42  ;;  %vm1170_vm0 = vcmp.ge.f32.partialorder %v3007_v58, %v3079_v42 }
 0x17c   : > { %v1277_v29 = vsel %vm1276_vm11, %v1273_v37, %v1216_v23  ;;  %v1279_v7 = vsel %vm1278_vm2, %v1275_v9, %v1218_v15  ;;  %v1228_v59 = vsel %vm1164_vm8, %v3164_v18, 256  ;;  %v1230_v16 = vsel %vm1166_vm15, %v3167_v60, 256  ;;  %v3949_v23 = vld [vmem:[#allocation34_spill] sm:$0xff]  ;;  %v3950_v15 = vld [vmem:[#allocation35_spill] sm:$0xff] }
 0x17d   : > { %vm1280_vm7 = vcmp.lt.s32.totalorder %v1277_v29, %v1220_v12  ;;  %vm1282_vm1 = vcmp.lt.s32.totalorder %v1279_v7, %v1222_v20  ;;  %vm1172_vm13 = vcmp.ge.f32.partialorder %v3020_v26, %v3079_v42  ;;  %vm1174_vm14 = vcmp.ge.f32.partialorder %v3023_v52, %v3079_v42  ;;  %v3325_v6 = vpop.trf.xlu0 }
 0x17e   : > { %v1281_v57 = vsel %vm1280_vm7, %v1277_v29, %v1220_v12  ;;  %v1283_v43 = vsel %vm1282_vm1, %v1279_v7, %v1222_v20  ;;  %v1232_v46 = vsel %vm1168_vm12, %v3170_v38, 256  ;;  %v1234_v58 = vsel %vm1170_vm0, %v3173_v10, 256  ;;  %v3952_v20 = vld [vmem:[#allocation38_spill] sm:$0xff]  ;;  %v3953_v29 = vld [vmem:[#allocation40_spill] sm:$0xff] }
 0x17f   : > { %vm1284_vm11 = vcmp.lt.s32.totalorder %v1281_v57, %v1224_v40  ;;  %vm1286_vm2 = vcmp.lt.s32.totalorder %v1283_v43, %v1226_v31  ;;  %vm1176_vm8 = vcmp.ge.f32.partialorder %v3036_v0, %v3079_v42  ;;  %vm1178_vm15 = vcmp.ge.f32.partialorder %v3038_v45, %v3079_v42  ;;  %v3951_v45 = vld [vmem:[#allocation15_spill] sm:$0xff]  ;;  %v3954_v7 = vld [vmem:[#allocation42_spill] sm:$0xff] }
 0x180   : > { %v1285_v33 = vsel %vm1284_vm11, %v1281_v57, %v1224_v40  ;;  %v1287_v17 = vsel %vm1286_vm2, %v1283_v43, %v1226_v31  ;;  %v1236_v26 = vsel %vm1172_vm13, %v3176_v14, 256  ;;  %v1238_v52 = vsel %vm1174_vm14, %v3179_v51, 256  ;;  %v3955_v31 = vld [vmem:[#allocation43_spill] sm:$0xff] }
 0x181   : > { %vm1288_vm7 = vcmp.lt.s32.totalorder %v1285_v33, %v1228_v59  ;;  %vm1290_vm1 = vcmp.lt.s32.totalorder %v1287_v17, %v1230_v16  ;;  %vm1180_vm12 = vcmp.ge.f32.partialorder %v3949_v23, %v3079_v42  ;;  %vm1182_vm0 = vcmp.ge.f32.partialorder %v3950_v15, %v3079_v42  ;;  %v3959_v23 = vld [vmem:[#allocation19_spill] sm:$0xff] }
 0x182   : > { %v1289_v36 = vsel %vm1288_vm7, %v1285_v33, %v1228_v59  ;;  %v1291_v56 = vsel %vm1290_vm1, %v1287_v17, %v1230_v16  ;;  %v1240_v0 = vsel %vm1176_vm8, %v3182_v19, 256  ;;  %v1242_v37 = vsel %vm1178_vm15, %v3951_v45, 256  ;;  %v3956_v16 = vld [vmem:[#allocation44_spill] sm:$0xff] }
 0x183   : > { %vm1292_vm11 = vcmp.lt.s32.totalorder %v1289_v36, %v1232_v46  ;;  %vm1294_vm2 = vcmp.lt.s32.totalorder %v1291_v56, %v1234_v58  ;;  %vm1184_vm13 = vcmp.ge.f32.partialorder %v3952_v20, %v3079_v42  ;;  %vm1186_vm14 = vcmp.ge.f32.partialorder %v3953_v29, %v3079_v42  ;;  %v3964_v20 = vld [vmem:[#allocation9_spill] sm:$0xff] }
 0x184   : > { %v1293_v8 = vsel %vm1292_vm11, %v1289_v36, %v1232_v46  ;;  %v1295_v48 = vsel %vm1294_vm2, %v1291_v56, %v1234_v58  ;;  %v1244_v40 = vsel %vm1180_vm12, %v3954_v7, 256  ;;  %v1246_v57 = vsel %vm1182_vm0, %v3955_v31, 256  ;;  %v3341_v36 = vpop.trf.xlu0 }
 0x185   : > { %vm1296_vm7 = vcmp.lt.s32.totalorder %v1293_v8, %v1236_v26  ;;  %vm1298_vm1 = vcmp.lt.s32.totalorder %v1295_v48, %v1238_v52  ;;  %v1248_v33 = vsel %vm1184_vm13, %v3956_v16, 256  ;;  %v1250_v17 = vsel %vm1186_vm14, %v3213_v24, 256 }
 0x186   : > { %v1297_v9 = vsel %vm1296_vm7, %v1293_v8, %v1236_v26  ;;  %v1299_v12 = vsel %vm1298_vm1, %v1295_v48, %v1238_v52  ;;  %v3957_v26 = vld [vmem:[#allocation17_spill] sm:$0xff]  ;;  %v1189_v52 = vsel %vm1125_vm3, %v3082_v61, 256  ;;  %v1193_v8 = vsel %vm1129_vm5, %v3110_v28, 256  ;;  %v3958_v48 = vld [vmem:[#allocation18_spill] sm:$0xff] }
 0x187   : > { %vm1300_vm11 = vcmp.lt.s32.totalorder %v1297_v9, %v1240_v0  ;;  %vm1302_vm2 = vcmp.lt.s32.totalorder %v1299_v12, %v1242_v37  ;;  %vm1147_vm12 = vcmp.ge.f32.partialorder %v3957_v26, %v3241_v3  ;;  %vm1149_vm0 = vcmp.ge.f32.partialorder %v3958_v48, %v3241_v3  ;;  %v3977_v48 = vld [vmem:[#allocation27_spill] sm:$0xff] }
 0x188   : > { %v1301_v43 = vsel %vm1300_vm11, %v1297_v9, %v1240_v0  ;;  %v1303_v59 = vsel %vm1302_vm2, %v1299_v12, %v1242_v37  ;;  %vm1151_vm1 = vcmp.ge.f32.partialorder %v3959_v23, %v3241_v3  ;;  %v1191_v15 = vsel %vm1127_vm4, %v3107_v34, 256  ;;  %v3962_v37 = vld [vmem:[#allocation7_spill] sm:$0xff] }
 0x189   : > { %vm1304_vm6 = vcmp.lt.s32.totalorder %v1301_v43, %v1244_v40  ;;  %vm1306_vm8 = vcmp.lt.s32.totalorder %v1303_v59, %v1246_v57  ;;  %vm3960_vm3 = vcmp.ge.f32.partialorder %v3942_v49, %v3241_v3  ;;  %vm1153_vm5 = vcmp.ge.f32.partialorder %v3961_v41, %v3241_v3 }
 0x18a   : > { %v1305_v46 = vsel %vm1304_vm6, %v1301_v43, %v1244_v40  ;;  %v1307_v58 = vsel %vm1306_vm8, %v1303_v59, %v1246_v57  ;;  %v1195_v44 = vsel %vm3960_vm3, %v3113_v53, 256  ;;  %v1197_v9 = vsel %vm1133_vm9, %v3962_v37, 256  ;;  %v3966_v40 = vld [vmem:[#allocation11_spill] sm:$0xff]  ;;  %v3389_v43 = vpop.trf.xlu0 }
 0x18b   : > { %vm1308_vm15 = vcmp.lt.s32.totalorder %v1305_v46, %v1248_v33  ;;  %vm1310_vm7 = vcmp.lt.s32.totalorder %v1307_v58, %v1250_v17  ;;  %v1199_v5 = vsel %vm1135_vm10, %v3119_v13, 256  ;;  %vm3963_vm4 = vcmp.ge.f32.partialorder %v3945_v11, %v3241_v3  ;;  %v3969_v11 = vld [vmem:[#allocation22_spill] sm:$0xff] }
 0x18c   : > { %v1309_v42 = vsel %vm1308_vm15, %v1305_v46, %v1248_v33  ;;  %v1311_v56 = vsel %vm1310_vm7, %v1307_v58, %v1250_v17  ;;  %v1201_v49 = vsel %vm3963_vm4, %v3122_v32, 256  ;;  %vm3965_vm13 = vcmp.ge.f32.partialorder %v3946_v54, %v3241_v3  ;;  %v3971_v58 = vld [vmem:[#allocation24_spill] sm:$0xff] }
 0x18d   : > { %vm1312_vm6 = vcmp.lt.s32.totalorder %v1309_v42, %v1311_v56  ;;  %v1203_v29 = vsel %vm3965_vm13, %v3964_v20, 256  ;;  %vm3967_vm9 = vcmp.ge.f32.partialorder %v3947_v21, %v3241_v3  ;;  %vm1323_vm14 = vcmp.lt.s32.totalorder %v1189_v52, %v1193_v8  ;;  %v3970_v21 = vld [vmem:[#allocation23_spill] sm:$0xff] }
 0x18e   : > { %v1313_v0 = vsel %vm1312_vm6, %v1309_v42, %v1311_v56  ;;  %v1205_v55 = vsel %vm3967_vm9, %v3966_v40, 256  ;;  %vm1155_vm10 = vcmp.ge.f32.partialorder %v3968_v25, %v3241_v3  ;;  %v1324_v57 = vsel %vm1323_vm14, %v1189_v52, %v1193_v8  ;;  %v3972_v56 = vld [vmem:[#allocation25_spill] sm:$0xff] }
 0x18f   : > { %v1314_v12 = vrot.slane %v1313_v0, 4  ;;  %vm1325_vm11 = vcmp.lt.s32.totalorder %v1191_v15, %v1195_v44  ;;  %vm1157_vm8 = vcmp.ge.f32.partialorder %v3969_v11, %v3241_v3  ;;  %vm1327_vm15 = vcmp.lt.s32.totalorder %v1324_v57, %v1197_v9  ;;  %v3973_v52 = vld [vmem:[#allocation13_spill] sm:$0xff] }
 0x190   : > { %v1326_v59 = vsel %vm1325_vm11, %v1191_v15, %v1195_v44  ;;  %v2263_v54 = vunpack.i.l.bf16 %v3325_v6  ;;  %vm1159_vm7 = vcmp.ge.f32.partialorder %v3970_v21, %v3241_v3  ;;  %v1328_v17 = vsel %vm1327_vm15, %v1324_v57, %v1197_v9  ;;  %v3410_v57 = vpop.trf.xlu0 }
 0x191   : > { %vm1315_vm2 = vcmp.lt.s32.totalorder %v1313_v0, %v1314_v12  ;;  %vm1329_vm6 = vcmp.lt.s32.totalorder %v1326_v59, %v1199_v5  ;;  %vm1161_vm3 = vcmp.ge.f32.partialorder %v3971_v58, %v3241_v3  ;;  %vm1331_vm4 = vcmp.lt.s32.totalorder %v1328_v17, %v1201_v49  ;;  %v3982_v58 = vld [vmem:[#allocation31_spill] sm:$0xff] }
 0x192   : > { %v1316_v33 = vsel %vm1315_vm2, %v1313_v0, %v1314_v12  ;;  %v1330_v42 = vsel %vm1329_vm6, %v1326_v59, %v1199_v5  ;;  %1714 = vmatprep.mubr.f32.mxu1 %v2263_v54  ;;  %vm3974_vm9 = vcmp.ge.f32.partialorder %v3948_v22, %v3241_v3  ;;  %vm3975_vm14 = vcmp.ge.f32.partialorder %v2813_v27, %v3241_v3  ;;  %v3976_v0 = vld [vmem:[#allocation26_spill] sm:$0xff] }
 0x193   : > { %v1317_v46 = vrot.slane %v1316_v33, 2  ;;  %v1207_v8 = vsel %vm3974_vm9, %v3973_v52, 256  ;;  %v1209_v15 = vsel %vm3975_vm14, %v3134_v4, 256  ;;  %v1332_v44 = vsel %vm1331_vm4, %v1328_v17, %v1201_v49 }
 0x194   : > { %vm1333_vm11 = vcmp.lt.s32.totalorder %v1330_v42, %v1203_v29  ;;  %vm1165_vm15 = vcmp.ge.f32.partialorder %v3976_v0, %v3241_v3  ;;  %vm1335_vm6 = vcmp.lt.s32.totalorder %v1332_v44, %v1205_v55  ;;  %v1211_v27 = vsel %vm1147_vm12, %v3137_v47, 256 }
 0x195   : > { %vm1318_vm2 = vcmp.lt.s32.totalorder %v1316_v33, %v1317_v46  ;;  %v1334_v9 = vsel %vm1333_vm11, %v1330_v42, %v1203_v29  ;;  %v1336_v12 = vsel %vm1335_vm6, %v1332_v44, %v1205_v55  ;;  %v1213_v49 = vsel %vm1149_vm0, %v3140_v39, 256  ;;  %v3979_v44 = vld [vmem:[#allocation29_spill] sm:$0xff] }
 0x196   : > { %v1319_v5 = vsel %vm1318_vm2, %v1316_v33, %v1317_v46  ;;  %vm1337_vm13 = vcmp.lt.s32.totalorder %v1334_v9, %v1207_v8  ;;  %vm1339_vm4 = vcmp.lt.s32.totalorder %v1336_v12, %v1209_v15  ;;  %v1215_v29 = vsel %vm1151_vm1, %v3143_v62, 256  ;;  %v3978_v46 = vld [vmem:[#allocation28_spill] sm:$0xff] }
 0x197   : > { %v1320_v22 = vrot.slane %v1319_v5, 1  ;;  %v1338_v59 = vsel %vm1337_vm13, %v1334_v9, %v1207_v8  ;;  %v1340_v55 = vsel %vm1339_vm4, %v1336_v12, %v1209_v15  ;;  %v1217_v26 = vsel %vm1153_vm5, %v3146_v30, 256 }
 0x198   : > { %vm1341_vm9 = vcmp.lt.s32.totalorder %v1338_v59, %v1211_v27  ;;  %vm1343_vm12 = vcmp.lt.s32.totalorder %v1340_v55, %v1213_v49  ;;  %vm1167_vm0 = vcmp.ge.f32.partialorder %v3977_v48, %v3241_v3  ;;  %v1219_v23 = vsel %vm1155_vm10, %v3149_v50, 256 }
 0x199   : > { %v1342_v54 = vsel %vm1341_vm9, %v1338_v59, %v1211_v27  ;;  %vm1321_vm13 = vcmp.lt.s32.totalorder %v1319_v5, %v1320_v22  ;;  %v1344_v33 = vsel %vm1343_vm12, %v1340_v55, %v1213_v49  ;;  %vm1169_vm11 = vcmp.ge.f32.partialorder %v3978_v46, %v3241_v3  ;;  %v3983_v49 = vld [vmem:[#allocation32_spill] sm:$0xff]  ;;  %v3984_v55 = vld [vmem:[#allocation33_spill] sm:$0xff] }
 0x19a   : > { %vm1345_vm14 = vcmp.lt.s32.totalorder %v1342_v54, %v1215_v29  ;;  %vm1347_vm1 = vcmp.lt.s32.totalorder %v1344_v33, %v1217_v26  ;;  %v1221_v41 = vsel %vm1157_vm8, %v3152_v35, 256  ;;  %v3440_v8 = vsel %vm1321_vm13, %v1319_v5, %v1320_v22  ;;  %v3980_v5 = vld [vmem:[#allocation30_spill] sm:$0xff] }
 0x19b   : > { %v1346_v17 = vsel %vm1345_vm14, %v1342_v54, %v1215_v29  ;;  %v1348_v42 = vsel %vm1347_vm1, %v1344_v33, %v1217_v26  ;;  %v1223_v25 = vsel %vm1159_vm7, %v3155_v1, 256  ;;  %vm1171_vm2 = vcmp.ge.f32.partialorder %v3979_v44, %v3241_v3  ;;  %v3985_v33 = vld [vmem:[#allocation36_spill] sm:$0xff] }
 0x19c   : > { %vm1349_vm5 = vcmp.lt.s32.totalorder %v1346_v17, %v1219_v23  ;;  %vm1351_vm10 = vcmp.lt.s32.totalorder %v1348_v42, %v1221_v41  ;;  %v1225_v11 = vsel %vm1161_vm3, %v3158_v63, 256  ;;  %vm1173_vm6 = vcmp.ge.f32.partialorder %v3980_v5, %v3241_v3 }
 0x19d   : > { %v1350_v15 = vsel %vm1349_vm5, %v1346_v17, %v1219_v23  ;;  %v1352_v9 = vsel %vm1351_vm10, %v1348_v42, %v1221_v41  ;;  %vm3981_vm4 = vcmp.ge.f32.partialorder %v3972_v56, %v3241_v3  ;;  %v1229_v22 = vsel %vm1165_vm15, %v3164_v18, 256  ;;  %v3986_v41 = vld [vmem:[#allocation37_spill] sm:$0xff] }
 0x19e   : > { %vm1353_vm8 = vcmp.lt.s32.totalorder %v1350_v15, %v1223_v25  ;;  %v1227_v21 = vsel %vm3981_vm4, %v3161_v2, 256  ;;  %vm1355_vm7 = vcmp.lt.s32.totalorder %v1352_v9, %v1225_v11  ;;  %vm1404_vm3 = vcmp.eq.s32.totalorder %v3119_v13, %v3440_v8 }
 0x19f   : > { %v1354_v12 = vsel %vm1353_vm8, %v1350_v15, %v1223_v25  ;;  %v1356_v27 = vsel %vm1355_vm7, %v1352_v9, %v1225_v11  ;;  %vm1175_vm12 = vcmp.ge.f32.partialorder %v3982_v58, %v3241_v3  ;;  %v1231_v56 = vsel %vm1167_vm0, %v3167_v60, 256  ;;  %v3987_v15 = vld [vmem:[#allocation39_spill] sm:$0xff]  ;;  %v3988_v9 = vld [vmem:[#allocation41_spill] sm:$0xff] }
 0x1a0   : > { %vm1357_vm9 = vcmp.lt.s32.totalorder %v1354_v12, %v1227_v21  ;;  %vm1359_vm13 = vcmp.lt.s32.totalorder %v1356_v27, %v1229_v22  ;;  %vm1177_vm14 = vcmp.ge.f32.partialorder %v3983_v49, %v3241_v3  ;;  %v1233_v0 = vsel %vm1169_vm11, %v3170_v38, 256 }
 0x1a1   : > { %v1358_v59 = vsel %vm1357_vm9, %v1354_v12, %v1227_v21  ;;  %v1360_v29 = vsel %vm1359_vm13, %v1356_v27, %v1229_v22  ;;  %vm1179_vm1 = vcmp.ge.f32.partialorder %v3984_v55, %v3241_v3  ;;  %v1235_v26 = vsel %vm1171_vm2, %v3173_v10, 256 }
 0x1a2   : > { %vm1361_vm15 = vcmp.lt.s32.totalorder %v1358_v59, %v1231_v56  ;;  %vm1363_vm0 = vcmp.lt.s32.totalorder %v1360_v29, %v1233_v0  ;;  %vm1181_vm5 = vcmp.ge.f32.partialorder %v3985_v33, %v3241_v3  ;;  %v1237_v48 = vsel %vm1173_vm6, %v3176_v14, 256 }
 0x1a3   : > { %v1362_v54 = vsel %vm1361_vm15, %v1358_v59, %v1231_v56  ;;  %v1364_v23 = vsel %vm1363_vm0, %v1360_v29, %v1233_v0  ;;  %v1239_v17 = vsel %vm1175_vm12, %v3179_v51, 256  ;;  %vm1446_vm2 = vcmp.eq.s32.totalorder %v3182_v19, %v3440_v8 }
 0x1a4   : > { %vm1365_vm11 = vcmp.lt.s32.totalorder %v1362_v54, %v1235_v26  ;;  %vm1367_vm10 = vcmp.lt.s32.totalorder %v1364_v23, %v1237_v48  ;;  %vm1183_vm8 = vcmp.ge.f32.partialorder %v3986_v41, %v3241_v3  ;;  %v1241_v42 = vsel %vm1177_vm14, %v3182_v19, 256 }
 0x1a5   : > { %v1366_v46 = vsel %vm1365_vm11, %v1362_v54, %v1235_v26  ;;  %v1368_v25 = vsel %vm1367_vm10, %v1364_v23, %v1237_v48  ;;  %vm1185_vm4 = vcmp.ge.f32.partialorder %v3987_v15, %v3241_v3  ;;  %v1243_v44 = vsel %vm1179_vm1, %v3951_v45, 256 }
 0x1a6   : > { %vm1369_vm6 = vcmp.lt.s32.totalorder %v1366_v46, %v1239_v17  ;;  %vm1371_vm7 = vcmp.lt.s32.totalorder %v1368_v25, %v1241_v42  ;;  %vm1187_vm9 = vcmp.ge.f32.partialorder %v3988_v9, %v3241_v3  ;;  %v1245_v5 = vsel %vm1181_vm5, %v3954_v7, 256 }
 0x1a7   : > { %v1370_v11 = vsel %vm1369_vm6, %v1366_v46, %v1239_v17  ;;  %v1372_v21 = vsel %vm1371_vm7, %v1368_v25, %v1241_v42  ;;  %v1247_v12 = vsel %vm1183_vm8, %v3955_v31, 256  ;;  %v1249_v27 = vsel %vm1185_vm4, %v3956_v16, 256 }
 0x1a8   : > { %vm1373_vm12 = vcmp.lt.s32.totalorder %v1370_v11, %v1243_v44  ;;  %vm1375_vm13 = vcmp.lt.s32.totalorder %v1372_v21, %v1245_v5  ;;  %v1251_v56 = vsel %vm1187_vm9, %v3213_v24, 256  ;;  %v2316_v48 = vmov 1966171168  }
 0x1a9   : > { %v1374_v22 = vsel %vm1373_vm12, %v1370_v11, %v1243_v44  ;;  %v1376_v58 = vsel %vm1375_vm13, %v1372_v21, %v1245_v5  ;;  %v1749_v23 = vunpack.c.l.s4 %v2316_v48  ;;  %v2317_v46 = vmov 1.0   ;;  %v2288_v44 = vld [vmem:[%s2380_s28 + $0x30] sm:$0xff] }
 0x1aa   : > { %vm1377_vm14 = vcmp.lt.s32.totalorder %v1374_v22, %v1247_v12  ;;  %vm1379_vm15 = vcmp.lt.s32.totalorder %v1376_v58, %v1249_v27  ;;  %vm1424_vm6 = vcmp.eq.s32.totalorder %v3149_v50, %v3440_v8  ;;  %vm1422_vm9 = vcmp.eq.s32.totalorder %v3146_v30, %v3440_v8 }
 0x1ab   : > { %v1378_v59 = vsel %vm1377_vm14, %v1374_v22, %v1247_v12  ;;  %v1380_v49 = vsel %vm1379_vm15, %v1376_v58, %v1249_v27  ;;  %v1750_v41 = vunpack.c.0.s8 %v1749_v23  ;;  %vm1420_vm13 = vcmp.eq.s32.totalorder %v3143_v62, %v3440_v8  ;;  %v2289_v22 = vld [vmem:[%s2380_s28 + $0x38] sm:$0xff] }
 0x1ac   : > { %vm1381_vm1 = vcmp.lt.s32.totalorder %v1378_v59, %v1251_v56  ;;  %v1809_v23 = vsub.s32 1, %v3082_v61 }
 0x1ad   : > { %v1382_v0 = vsel %vm1381_vm1, %v1378_v59, %v1251_v56  ;;  %vm1418_vm1 = vcmp.eq.s32.totalorder %v3140_v39, %v3440_v8 }
 0x1ae   : > { %vm1383_vm0 = vcmp.lt.s32.totalorder %v1380_v49, %v1382_v0 }
 0x1af   : > { %v1384_v3 = vsel %vm1383_vm0, %v1380_v49, %v1382_v0 }
 0x1b0   : > { %v1385_v29 = vrot.slane %v1384_v3, 4 }
 0x1b2   : > { %vm1386_vm5 = vcmp.lt.s32.totalorder %v1384_v3, %v1385_v29 }
 0x1b3   : > { %v1387_v55 = vsel %vm1386_vm5, %v1384_v3, %v1385_v29  ;;  %vm1416_vm5 = vcmp.eq.s32.totalorder %v3137_v47, %v3440_v8 }
 0x1b4   : > { %v1388_v26 = vrot.slane %v1387_v55, 2 }
 0x1b6   : > { %vm1389_vm11 = vcmp.lt.s32.totalorder %v1387_v55, %v1388_v26 }
 0x1b7   : > { %v1390_v54 = vsel %vm1389_vm11, %v1387_v55, %v1388_v26 }
 0x1b8   : > { %v1391_v33 = vrot.slane %v1390_v54, 1 }
 0x1ba   : > { %vm1392_vm10 = vcmp.lt.s32.totalorder %v1390_v54, %v1391_v33 }
 0x1bb   : > { %v3515_v17 = vsel %vm1392_vm10, %v1390_v54, %v1391_v33  ;;  %vm1414_vm10 = vcmp.eq.s32.totalorder %v3134_v4, %v3440_v8  ;;  %v1805_v33 = vsub.s32 0, %v3082_v61 }
 0x1bc   : > { %vm1425_vm8 = vcmp.eq.s32.totalorder %v3149_v50, %v3515_v17  ;;  %vm1423_vm4 = vcmp.eq.s32.totalorder %v3146_v30, %v3515_v17  ;;  %vm1405_vm7 = vcmp.eq.s32.totalorder %v3119_v13, %v3515_v17  ;;  %vm1421_vm12 = vcmp.eq.s32.totalorder %v3143_v62, %v3515_v17  ;;  %v2283_v13 = vld [vmem:[%s2380_s28] sm:$0xff] }
 0x1bd   : > { %2132 = vmatprep.subr.msk.mxu1 %vm1425_vm8, %v2317_v46  ;;  %vm1447_vm14 = vcmp.eq.s32.totalorder %v3182_v19, %v3515_v17  ;;  %vm1419_vm15 = vcmp.eq.s32.totalorder %v3140_v39, %v3515_v17  ;;  %v3542_v50 = vsub.s32 %v1750_v41, %v3082_v61  ;;  %vm1417_vm0 = vcmp.eq.s32.totalorder %v3137_v47, %v3515_v17 }
 0x1be   : > { %2133 = vmatpush1.msk.msra.mxu1 %vm1424_vm6, %v2317_v46  ;;  %v1747_v30 = vcombine.low %v3440_v8, %v3515_v17  ;;  %vm1415_vm11 = vcmp.eq.s32.totalorder %v3134_v4, %v3515_v17  ;;  %v3989_v39 = vlaneseq  ;;  %vm1413_vm6 = vcmp.eq.s32.totalorder %v3973_v52, %v3515_v17  ;;  %v2284_v4 = vld [vmem:[%s2380_s28 + $0x18] sm:$0xff] }
 0x1bf   : > { %2134 = vmatprep.subr.msk.mxu1 %vm1423_vm4, %v2317_v46  ;;  %vm1412_vm4 = vcmp.eq.s32.totalorder %v3973_v52, %v3440_v8  ;;  %v2266_v19 = vunpack.i.h.bf16 %v3325_v6  ;;  %v2285_v6 = vld [vmem:[%s2380_s28 + $0x8] sm:$0xff] }
 0x1c0   : > { %2135 = vmatpush1.msk.msra.mxu1 %vm1422_vm9, %v2317_v46  ;;  %v1754_v62 = vrot.slane %v1747_v30, %v3542_v50  ;;  %vm3570_vm8 = vcmp.lt.s32.totalorder %v3989_v39, 256  ;;  %vm1411_vm9 = vcmp.eq.s32.totalorder %v3966_v40, %v3515_v17 }
 0x1c1   : > { %2136 = vmatprep.subr.msk.mxu1 %vm1421_vm12, %v2317_v46  ;;  %vm1410_vm12 = vcmp.eq.s32.totalorder %v3966_v40, %v3440_v8 }
 0x1c2   : > { %2137 = vmatpush1.msk.msra.mxu1 %vm1420_vm13, %v2317_v46  ;;  %v1761_v47 = vrot.slane %v1754_v62, %v3542_v50  ;;  %vm1409_vm13 = vcmp.eq.s32.totalorder %v3964_v20, %v3515_v17 }
 0x1c3   : > { %2138 = vmatprep.subr.msk.mxu1 %vm1419_vm15, %v2317_v46  ;;  %vm1408_vm15 = vcmp.eq.s32.totalorder %v3964_v20, %v3440_v8 }
 0x1c4   : > { %2139 = vmatpush1.msk.msra.mxu1 %vm1418_vm1, %v2317_v46  ;;  %1766 = vst.msk [vmem:[%s356_s10] sm:$0x3] %vm3570_vm8, %v1761_v47  ;;  %vm1407_vm1 = vcmp.eq.s32.totalorder %v3122_v32, %v3515_v17 }
 0x1c5   : > { %2140 = vmatprep.subr.msk.mxu1 %vm1417_vm0, %v2317_v46  ;;  %vm1406_vm0 = vcmp.eq.s32.totalorder %v3122_v32, %v3440_v8 }
 0x1c6   : > { %2141 = vmatpush1.msk.msra.mxu1 %vm1416_vm5, %v2317_v46  ;;  %vm1403_vm5 = vcmp.eq.s32.totalorder %v3962_v37, %v3515_v17 }
 0x1c7   : > { %2142 = vmatprep.subr.msk.mxu1 %vm1415_vm11, %v2317_v46  ;;  %vm1402_vm11 = vcmp.eq.s32.totalorder %v3962_v37, %v3440_v8 }
 0x1c8   : > { %2143 = vmatpush1.msk.msra.mxu1 %vm1414_vm10, %v2317_v46  ;;  %vm1401_vm10 = vcmp.eq.s32.totalorder %v3113_v53, %v3515_v17 }
 0x1c9   : > { %2144 = vmatprep.subr.msk.mxu1 %vm1413_vm6, %v2317_v46  ;;  %vm1398_vm6 = vcmp.eq.s32.totalorder %v3110_v28, %v3440_v8 }
 0x1ca   : > { %2145 = vmatpush1.msk.msra.mxu1 %vm1412_vm4, %v2317_v46  ;;  %vm1397_vm4 = vcmp.eq.s32.totalorder %v3107_v34, %v3515_v17 }
 0x1cb   : > { %2146 = vmatprep.subr.msk.mxu1 %vm1411_vm9, %v2317_v46  ;;  %vm1396_vm9 = vcmp.eq.s32.totalorder %v3107_v34, %v3440_v8  ;;  %v2282_v34 = vld [vmem:[%s2380_s28 + $0x10] sm:$0xff] }
 0x1cc   : > { %2147 = vmatpush1.msk.msra.mxu1 %vm1410_vm12, %v2317_v46  ;;  %vm1395_vm12 = vcmp.eq.s32.totalorder %v3082_v61, %v3515_v17 }
 0x1cd   : > { %2148 = vmatprep.subr.msk.mxu1 %vm1409_vm13, %v2317_v46  ;;  %vm1394_vm13 = vcmp.eq.s32.totalorder %v3082_v61, %v3440_v8 }
 0x1ce   : > { %2149 = vmatpush1.msk.msra.mxu1 %vm1408_vm15, %v2317_v46  ;;  %vm1457_vm15 = vcmp.eq.s32.totalorder %v3213_v24, %v3515_v17 }
 0x1cf   : > { %2150 = vmatprep.subr.msk.mxu1 %vm1407_vm1, %v2317_v46  ;;  %vm1456_vm1 = vcmp.eq.s32.totalorder %v3213_v24, %v3440_v8 }
 0x1d0   : > { %2151 = vmatpush1.msk.msra.mxu1 %vm1406_vm0, %v2317_v46  ;;  %vm1455_vm0 = vcmp.eq.s32.totalorder %v3956_v16, %v3515_v17 }
 0x1d1   : > { %2152 = vmatprep.subr.msk.mxu1 %vm1405_vm7, %v2317_v46  ;;  %vm1400_vm7 = vcmp.eq.s32.totalorder %v3113_v53, %v3440_v8 }
 0x1d2   : > { %2153 = vmatpush1.msk.msra.mxu1 %vm1404_vm3, %v2317_v46  ;;  %vm1399_vm3 = vcmp.eq.s32.totalorder %v3110_v28, %v3515_v17 }
 0x1d3   : > { %2154 = vmatprep.subr.msk.mxu1 %vm1403_vm5, %v2317_v46  ;;  %vm1454_vm5 = vcmp.eq.s32.totalorder %v3956_v16, %v3440_v8 }
 0x1d4   : > { %2155 = vmatpush1.msk.msra.mxu1 %vm1402_vm11, %v2317_v46  ;;  %vm1453_vm11 = vcmp.eq.s32.totalorder %v3955_v31, %v3515_v17 }
 0x1d5   : > { %2156 = vmatprep.subr.msk.mxu1 %vm1401_vm10, %v2317_v46  ;;  %vm1452_vm10 = vcmp.eq.s32.totalorder %v3955_v31, %v3440_v8  ;;  %v2286_v31 = vld [vmem:[%s2380_s28 + $0x20] sm:$0xff] }
 0x1d6   : > { %2157 = vmatpush1.msk.msra.mxu1 %vm1400_vm7, %v2317_v46  ;;  %vm1451_vm7 = vcmp.eq.s32.totalorder %v3954_v7, %v3515_v17 }
 0x1d7   : > { %2158 = vmatprep.subr.msk.mxu1 %vm1399_vm3, %v2317_v46  ;;  %vm1450_vm3 = vcmp.eq.s32.totalorder %v3954_v7, %v3440_v8 }
 0x1d8   : > { %2159 = vmatpush1.msk.msra.mxu1 %vm1398_vm6, %v2317_v46  ;;  %vm1449_vm6 = vcmp.eq.s32.totalorder %v3951_v45, %v3515_v17 }
 0x1d9   : > { %2160 = vmatprep.subr.msk.mxu1 %vm1397_vm4, %v2317_v46  ;;  %vm1448_vm4 = vcmp.eq.s32.totalorder %v3951_v45, %v3440_v8 }
 0x1da   : > { %2161 = vmatpush1.msk.msra.mxu1 %vm1396_vm9, %v2317_v46  ;;  %vm1445_vm9 = vcmp.eq.s32.totalorder %v3179_v51, %v3515_v17 }
 0x1db   : > { %2162 = vmatprep.subr.msk.mxu1 %vm1395_vm12, %v2317_v46  ;;  %vm1444_vm12 = vcmp.eq.s32.totalorder %v3179_v51, %v3440_v8  ;;  %v2268_v51 = vunpack.i.l.bf16 %v3341_v36 }
 0x1dc   : > { %2163 = vmatpush1.msk.msra.mxu1 %vm1394_vm13, %v2317_v46  ;;  %vm1443_vm13 = vcmp.eq.s32.totalorder %v3176_v14, %v3515_v17 }
 0x1dd   : > { %2164 = vmatprep.subr.msk.mxu1 %vm1457_vm15, %v2317_v46  ;;  %vm1440_vm15 = vcmp.eq.s32.totalorder %v3173_v10, %v3440_v8 }
 0x1de   : > { %2165 = vmatpush2.msk.msra.mxu1 %vm1456_vm1, %v2317_v46  ;;  %vm1439_vm1 = vcmp.eq.s32.totalorder %v3170_v38, %v3515_v17 }
 0x1df   : > { %2166 = vmatprep.subr.msk.mxu1 %vm1455_vm0, %v2317_v46  ;;  %vm1438_vm0 = vcmp.eq.s32.totalorder %v3170_v38, %v3440_v8 }
 0x1e0   : > { %2167 = vmatpush2.msk.msra.mxu1 %vm1454_vm5, %v2317_v46  ;;  %vm1437_vm5 = vcmp.eq.s32.totalorder %v3167_v60, %v3515_v17 }
 0x1e1   : > { %2168 = vmatprep.subr.msk.mxu1 %vm1453_vm11, %v2317_v46  ;;  %vm1436_vm11 = vcmp.eq.s32.totalorder %v3167_v60, %v3440_v8  ;;  %v2273_v60 = vunpack.i.l.bf16 %v3389_v43 }
 0x1e2   : > { %2169 = vmatpush2.msk.msra.mxu1 %vm1452_vm10, %v2317_v46  ;;  %vm1435_vm10 = vcmp.eq.s32.totalorder %v3164_v18, %v3515_v17 }
 0x1e3   : > { %2170 = vmatprep.subr.msk.mxu1 %vm1451_vm7, %v2317_v46  ;;  %vm1434_vm7 = vcmp.eq.s32.totalorder %v3164_v18, %v3440_v8  ;;  %v2276_v18 = vunpack.i.h.bf16 %v3389_v43  ;;  %v2287_v43 = vld [vmem:[%s2380_s28 + $0x28] sm:$0xff] }
 0x1e4   : > { %2171 = vmatpush2.msk.msra.mxu1 %vm1450_vm3, %v2317_v46  ;;  %vm1433_vm3 = vcmp.eq.s32.totalorder %v3161_v2, %v3515_v17 }
 0x1e5   : > { %2172 = vmatprep.subr.msk.mxu1 %vm1449_vm6, %v2317_v46  ;;  %vm1432_vm6 = vcmp.eq.s32.totalorder %v3161_v2, %v3440_v8  ;;  %v2278_v2 = vunpack.i.l.bf16 %v3410_v57 }
 0x1e6   : > { %2173 = vmatpush2.msk.msra.mxu1 %vm1448_vm4, %v2317_v46  ;;  %vm1431_vm4 = vcmp.eq.s32.totalorder %v3158_v63, %v3515_v17 }
 0x1e7   : > { %2174 = vmatprep.subr.msk.mxu1 %vm1447_vm14, %v2317_v46  ;;  %vm1442_vm14 = vcmp.eq.s32.totalorder %v3176_v14, %v3440_v8  ;;  %v2271_v14 = vunpack.i.h.bf16 %v3341_v36 }
 0x1e8   : > { %2175 = vmatpush2.msk.msra.mxu1 %vm1446_vm2, %v2317_v46  ;;  %vm1441_vm2 = vcmp.eq.s32.totalorder %v3173_v10, %v3515_v17 }
 0x1e9   : > { %2176 = vmatprep.subr.msk.mxu1 %vm1445_vm9, %v2317_v46  ;;  %vm1430_vm9 = vcmp.eq.s32.totalorder %v3158_v63, %v3440_v8  ;;  %v2281_v63 = vunpack.i.h.bf16 %v3410_v57 }
 0x1ea   : > { %2177 = vmatpush2.msk.msra.mxu1 %vm1444_vm12, %v2317_v46  ;;  %vm1429_vm12 = vcmp.eq.s32.totalorder %v3155_v1, %v3515_v17 }
 0x1eb   : > { %2178 = vmatprep.subr.msk.mxu1 %vm1443_vm13, %v2317_v46  ;;  %vm1428_vm13 = vcmp.eq.s32.totalorder %v3155_v1, %v3440_v8 }
 0x1ec   : > { %2179 = vmatpush2.msk.msra.mxu1 %vm1442_vm14, %v2317_v46  ;;  %vm1427_vm14 = vcmp.eq.s32.totalorder %v3152_v35, %v3515_v17  ;;  %v1801_v17 = vld [vmem:[%s337_s14] sm:$0x3] }
 0x1ed   : > { %2180 = vmatprep.subr.msk.mxu1 %vm1441_vm2, %v2317_v46  ;;  %vm1426_vm2 = vcmp.eq.s32.totalorder %v3152_v35, %v3440_v8  ;;  %v1806_v62 = vrot.slane %v1801_v17, %v1805_v33  ;;  %v1810_v47 = vrot.slane %v1801_v17, %v1809_v23 }
 0x1ee   : > { %2181 = vmatpush2.msk.msra.mxu1 %vm1440_vm15, %v2317_v46 }
 0x1ef   : > { %2182 = vmatprep.subr.msk.mxu1 %vm1439_vm1, %v2317_v46 }
 0x1f0   : > { %2183 = vmatpush2.msk.msra.mxu1 %vm1438_vm0, %v2317_v46 }
 0x1f1   : > { %2184 = vmatprep.subr.msk.mxu1 %vm1437_vm5, %v2317_v46 }
 0x1f2   : > { %2185 = vmatpush2.msk.msra.mxu1 %vm1436_vm11, %v2317_v46 }
 0x1f3   : > { %2186 = vmatprep.subr.msk.mxu1 %vm1435_vm10, %v2317_v46 }
 0x1f4   : > { %2187 = vmatpush2.msk.msra.mxu1 %vm1434_vm7, %v2317_v46 }
 0x1f5   : > { %2188 = vmatprep.subr.msk.mxu1 %vm1433_vm3, %v2317_v46 }
 0x1f6   : > { %2189 = vmatpush2.msk.msra.mxu1 %vm1432_vm6, %v2317_v46 }
 0x1f7   : > { %2190 = vmatprep.subr.msk.mxu1 %vm1431_vm4, %v2317_v46 }
 0x1f8   : > { %2191 = vmatpush2.msk.msra.mxu1 %vm1430_vm9, %v2317_v46 }
 0x1f9   : > { %2192 = vmatprep.subr.msk.mxu1 %vm1429_vm12, %v2317_v46 }
 0x1fa   : > { %2193 = vmatpush2.msk.msra.mxu1 %vm1428_vm13, %v2317_v46 }
 0x1fb   : > { %2194 = vmatprep.subr.msk.mxu1 %vm1427_vm14, %v2317_v46 }
 0x1fc   : > { %2195 = vmatpush2.msk.msra.mxu1 %vm1426_vm2, %v2317_v46 }
 0x1fd   : > { %1715 = vmatmul.mubr.f32.vlgmr.msra.gmra.mxu1 %v2266_v19 }
 0x1fe   : > { %1720 = vmatprep.mubr.f32.mxu1 %v2268_v51 }
 0x201   : > { %1721 = vmatmul.mubr.f32.gmra.mxu1 %v2271_v14 }
 0x202   : > { %1726 = vmatprep.mubr.f32.mxu1 %v2273_v60 }
 0x205   : > { %1727 = vmatmul.mubr.f32.gmra.mxu1 %v2276_v18 }
 0x206   : > { %1732 = vmatprep.mubr.f32.mxu1 %v2278_v2 }
 0x209   : > { %1733 = vmatmul.mubr.f32.gmra.mxu1 %v2281_v63 }
 0x2bd   : > { %v1716_v1 = vpop.f32.mrf.mxu1 }
 0x2be   : > { %1739 = vst [vmem:[%s3750_s13] sm:$0xff] %v1716_v1  ;;  %v1767_v32 = vsub.f32 %v1716_v1, %v2283_v13 }
 0x2bf   : > { %v1718_v35 = vpop.f32.mrf.mxu1 }
 0x2c0   : > { %1740 = vst [vmem:[%s3750_s13 + $0x8] sm:$0xff] %v1718_v35  ;;  %v1768_v45 = vsub.f32 %v1718_v35, %v2285_v6  ;;  %v1775_v37 = vmul.f32 %v1767_v32, %v1767_v32 }
 0x2c1   : > { %v1722_v24 = vpop.f32.mrf.mxu1 }
 0x2c2   : > { %1741 = vst [vmem:[%s3750_s13 + $0x10] sm:$0xff] %v1722_v24  ;;  %v1769_v28 = vsub.f32 %v1722_v24, %v2282_v34  ;;  %v1776_v8 = vmul.f32 %v1768_v45, %v1768_v45 }
 0x2c3   : > { %v1724_v53 = vpop.f32.mrf.mxu1 }
 0x2c4   : > { %1742 = vst [vmem:[%s3750_s13 + $0x18] sm:$0xff] %v1724_v53  ;;  %v1770_v38 = vsub.f32 %v1724_v53, %v2284_v4  ;;  %v1777_v7 = vmul.f32 %v1769_v28, %v1769_v28 }
 0x2c5   : > { %v1728_v10 = vpop.f32.mrf.mxu1 }
 0x2c6   : > { %1743 = vst [vmem:[%s3750_s13 + $0x20] sm:$0xff] %v1728_v10  ;;  %v1771_v16 = vsub.f32 %v1728_v10, %v2286_v31  ;;  %v1778_v20 = vmul.f32 %v1770_v38, %v1770_v38  ;;  %v1783_v25 = vadd.f32 %v1777_v7, %v1775_v37 }
 0x2c7   : > { %v1730_v36 = vpop.f32.mrf.mxu1 }
 0x2c8   : > { %v1779_v40 = vmul.f32 %v1771_v16, %v1771_v16  ;;  %1744 = vst [vmem:[%s3750_s13 + $0x28] sm:$0xff] %v1730_v36  ;;  %v1772_v52 = vsub.f32 %v1730_v36, %v2287_v43  ;;  %v1792_v5 = vadd.f32 %v1778_v20, %v1776_v8 }
 0x2c9   : > { %v1734_v57 = vpop.f32.mrf.mxu1 }
 0x2ca   : > { %v1780_v15 = vmul.f32 %v1772_v52, %v1772_v52  ;;  %1745 = vst [vmem:[%s3750_s13 + $0x30] sm:$0xff] %v1734_v57  ;;  %v1773_v11 = vsub.f32 %v1734_v57, %v2288_v44  ;;  %v1784_v21 = vadd.f32 %v1783_v25, %v1779_v40 }
 0x2cb   : > { %v1736_v9 = vpop.f32.mrf.mxu1 }
 0x2cc   : > { %v1781_v12 = vmul.f32 %v1773_v11, %v1773_v11  ;;  %1746 = vst [vmem:[%s3750_s13 + $0x38] sm:$0xff] %v1736_v9  ;;  %v1774_v27 = vsub.f32 %v1736_v9, %v2289_v22  ;;  %v1793_v58 = vadd.f32 %v1792_v5, %v1780_v15 }
 0x2ce   : > { %v1785_v56 = vadd.f32 %v1784_v21, %v1781_v12  ;;  %v1782_v59 = vmul.f32 %v1774_v27, %v1774_v27 }
 0x2d0   : > { %v1786_v49 = vrot.slane %v1785_v56, 4  ;;  %v1794_v0 = vadd.f32 %v1793_v58, %v1782_v59 }
 0x2d2   : > { %v1787_v3 = vadd.f32 %v1786_v49, %v1785_v56  ;;  %v1795_v29 = vrot.slane %v1794_v0, 4 }
 0x2d4   : > { %v1788_v55 = vrot.slane %v1787_v3, 2  ;;  %v1796_v26 = vadd.f32 %v1795_v29, %v1794_v0 }
 0x2d6   : > { %v1789_v54 = vadd.f32 %v1788_v55, %v1787_v3  ;;  %v1797_v48 = vrot.slane %v1796_v26, 2 }
 0x2d8   : > { %v1790_v46 = vrot.slane %v1789_v54, 1  ;;  %v1798_v41 = vadd.f32 %v1797_v48, %v1796_v26 }
 0x2da   : > { %v1791_v30 = vadd.f32 %v1790_v46, %v1789_v54  ;;  %v1799_v39 = vrot.slane %v1798_v41, 1 }
 0x2dc   : > { %v1800_v19 = vadd.f32 %v1799_v39, %v1798_v41  ;;  %v1813_v51 = vmul.f32 %v1806_v62, %v1791_v30 }
 0x2de   : > { %v1814_v14 = vmul.f32 %v1810_v47, %v1800_v19 }
 0x2e0   : > { %v1817_v60 = vcombine.low %v1813_v51, %v1814_v14 }
 0x2e2   : > { %v1824_v18 = vrot.slane %v1817_v60, %v3542_v50 }
 0x2e4   : > { %v1831_v2 = vrot.slane %v1824_v18, %v3542_v50 }
 0x2e6   : > { %1833 = vst.msk [vmem:[%s365_s16] sm:$0x3] %vm3570_vm8, %v1831_v2 }
 0x2e7 PF: > { %s17_s23 = sadd.s32 1, %s2312_s23   ;;  %s3992_s21 = smov %s2308_s22 }
 0x2e8   : > { %p14_p5 = scmp.ge.s32.totalorder %s17_s23, 4   ;;  %s3993_s22 = smov %s3995_s24 }
 0x2ea   :  { %16 = sbr.rel (!%p14_p5) target bundleno = 2 (0x2), region = 93 }

</bundles_post_ra>
